<compile_context>
chip_gen: v6e
topology: v6e:2x2x1
jax: 0.10.0
libtpu: 0.0.40
codegen_flags: <defaults>
</compile_context>

<pallas_src>
import functools
import math

import jax
import jax.numpy as jnp
from jax.experimental import pallas as pl
from jax.experimental.pallas import tpu as pltpu

LANE = 128
BN_EPS = 1e-5


def _round_up(x, m):
    return (x + m - 1) // m * m


def _pad_axis(x, target, axis):
    pad = target - x.shape[axis]
    if pad == 0:
        return x
    widths = [(0, 0)] * x.ndim
    widths[axis] = (0, pad)
    return jnp.pad(x, widths)


# ---------------------------------------------------------------------------
# Kernel: one (row-tile, K-tile) grid step of
#     out = relu( patches @ W_folded + shift [+ residual] )
# ---------------------------------------------------------------------------
def _conv_mm_kernel(*refs, relu, has_res):
    if has_res:
        x_ref, w_ref, shift_ref, res_ref, o_ref, acc_ref = refs
    else:
        x_ref, w_ref, shift_ref, o_ref, acc_ref = refs
        res_ref = None

    kx = pl.program_id(1)

    @pl.when(kx == 0)
    def _():
        acc_ref[...] = jnp.zeros_like(acc_ref)

    # Canonical scratch-ref accumulate -> accumulating MXU matmuls.
    acc_ref[...] += jnp.dot(x_ref[...], w_ref[...],
                            preferred_element_type=jnp.float32)

    @pl.when(kx == pl.num_programs(1) - 1)
    def _():
        y = acc_ref[...] + shift_ref[...]          # folded BN shift (f32)
        if has_res:
            y = y + res_ref[...].astype(jnp.float32)
        if relu:
            y = jnp.maximum(y, 0.0)
        o_ref[...] = y.astype(o_ref.dtype)


def conv_bn_act(x, pw, *, relu=True, residual=None,
                compute_dtype=jnp.bfloat16, m_cap=256, k_cap=512):
    """Stride-1 'same' conv + folded BN affine (+ residual add) (+ ReLU).

    x:        (N, H, W, c_in)   NHWC, real channel count, f32
    pw:       packed conv dict: {"w": (k*k, c_in, cp_out) bf16 BN-folded,
                                 "shift": (c_out,) f32}
    residual: optional (N, H, W, c_out) f32 added before the ReLU
    returns   (N, H, W, c_out) f32
    """
    N, H, W, c_in = x.shape
    kk, c_in_w, cp_out = pw["w"].shape
    assert c_in_w == c_in, (c_in_w, c_in)
    c_out = pw["shift"].shape[0]
    k = math.isqrt(kk)
    assert k * k == kk and k % 2 == 1, "only odd 'same' kernels supported"
    p = (k - 1) // 2
    # TODO(synk): stride>1 convolutions are not needed by this Hourglass
    # (downsampling is MaxPool2d); only stride=1 is implemented.

    # im2col patches indexed at OUTPUT coordinates -> no halo rows in the
    # output, residual/shift rows align 1:1 with output rows.  For the small
    # real channel counts here K = k*k*c_in <= 128, so this costs no more HBM
    # traffic than the old 128-lane zero-padded activation while collapsing
    # the 9 shifted matmuls into one dense-K matmul per tile.
    # TODO(synk): for real c_in >= 128 (production hourglass dims 256/384/512)
    # switch to a shifted-tap / halo-tiled scheme to avoid k*k x input traffic,
    # and pad channels to multiples of 256 on v6e/v7x MXUs.
    if k == 1:
        patches = x
    else:
        xp = jnp.pad(x, ((0, 0), (p, p), (p, p), (0, 0)))
        cols = [xp[:, dh:dh + H, dw:dw + W, :]
                for dh in range(k) for dw in range(k)]
        patches = jnp.concatenate(cols, axis=-1)        # (N, H, W, k*k*c_in)

    m = N * H * W
    K = kk * c_in
    patches = patches.reshape(m, K).astype(compute_dtype)

    # Row (M) and contraction (K) tiling.
    n_row = pl.cdiv(m, m_cap)              # >=2 parallel steps at full res
    tm = _round_up(pl.cdiv(m, n_row), 8)
    m_pad = tm * n_row
    n_k = pl.cdiv(K, k_cap)
    tk = _round_up(pl.cdiv(K, n_k), LANE)  # lane-dense contraction blocks
    kp = tk * n_k

    patches = _pad_axis(_pad_axis(patches, kp, 1), m_pad, 0)
    wmat = _pad_axis(pw["w"].reshape(K, cp_out), kp, 0)
    shift_row = _pad_axis(pw["shift"].astype(jnp.float32), cp_out, 0)
    shift_row = shift_row.reshape(1, cp_out)

    operands = [patches, wmat, shift_row]
    in_specs = [
        pl.BlockSpec((tm, tk), lambda i, kx: (i, kx)),
        pl.BlockSpec((tk, cp_out), lambda i, kx: (kx, 0)),
        # TODO(synk): pipeline_mode=pl.Buffered(1) on these constant-index
        # weight/shift blocks would drop their redundant second pipeline
        # buffer (VMEM footprint here is already tiny).
        pl.BlockSpec((1, cp_out), lambda i, kx: (0, 0)),
    ]
    has_res = residual is not None
    if has_res:
        assert residual.shape[:3] == (N, H, W), residual.shape
        r = _pad_axis(residual.astype(jnp.float32), cp_out, 3)
        r = _pad_axis(r.reshape(m, cp_out), m_pad, 0)
        operands.append(r)
        in_specs.append(pl.BlockSpec((tm, cp_out), lambda i, kx: (i, 0)))

    out = pl.pallas_call(
        functools.partial(_conv_mm_kernel, relu=relu, has_res=has_res),
        out_shape=jax.ShapeDtypeStruct((m_pad, cp_out), jnp.float32),
        grid_spec=pltpu.PrefetchScalarGridSpec(
            num_scalar_prefetch=0,
            grid=(n_row, n_k),
            in_specs=in_specs,
            out_specs=pl.BlockSpec((tm, cp_out), lambda i, kx: (i, 0)),
            scratch_shapes=[pltpu.VMEM((tm, cp_out), jnp.float32)],
        ),
        compiler_params=pltpu.CompilerParams(
            dimension_semantics=("parallel", "arbitrary")),
    )(*operands)

    # Valid rows / real channels (lane padding sliced off once per conv).
    return out[:m].reshape(N, H, W, cp_out)[..., :c_out]


# ---------------------------------------------------------------------------
# residual block / layers / hourglass (Pallas forward, NHWC f32 activations)
# ---------------------------------------------------------------------------
def residual_block(x, p):
    y = conv_bn_act(x, p["conv1"], relu=True)
    if "skip" in p:
        skip = conv_bn_act(x, p["skip"], relu=False)
    else:
        skip = x                                   # identity skip stays f32
    return conv_bn_act(y, p["conv2"], relu=True, residual=skip)


def run_layer(x, blocks):
    for p in blocks:
        x = residual_block(x, p)
    return x


def maxpool2(x):
    # TODO(synk): 2x2 max-pool is pure data movement, left to fused XLA ops.
    N, H, W, C = x.shape
    return x.reshape(N, H // 2, 2, W // 2, 2, C).max(axis=(2, 4))


def merge_up(up1, low3):
    # Fused nearest-2x upsample + MergeUp: one broadcasted elementwise add,
    # no materialized jnp.repeat intermediates.
    N, H, W, C = up1.shape
    u = up1.reshape(N, H // 2, 2, W // 2, 2, C)
    return (u + low3[:, :, None, :, None, :]).reshape(N, H, W, C)


def hourglass_forward(x, pp, n):
    up1 = run_layer(x, pp["up1"])
    low1 = run_layer(maxpool2(x), pp["low1"])
    if n > 1:
        low2 = hourglass_forward(low1, pp["low2"], n - 1)
    else:
        low2 = run_layer(low1, pp["low2"])
    low3 = run_layer(low2, pp["low3"])
    return merge_up(up1, low3)


def pallas_hourglass(x_nchw, packed, *, n):
    x = jnp.transpose(x_nchw, (0, 2, 3, 1)).astype(jnp.float32)
    y = hourglass_forward(x, packed, n)
    return jnp.transpose(y, (0, 3, 1, 2))          # back to NCHW


# ---------------------------------------------------------------------------
# one-time weight pre-packing (BN fold + transpose + lane-pad + bf16 cast)
# ---------------------------------------------------------------------------
def pack_conv(weight, scale, shift, compute_dtype=jnp.bfloat16):
    c_out, c_in, kh, kw = weight.shape
    assert kh == kw
    cp_out = _round_up(c_out, LANE)
    w = weight.astype(jnp.float32) * scale.astype(jnp.float32)[:, None, None, None]
    w = jnp.transpose(w, (2, 3, 1, 0)).reshape(kh * kw, c_in, c_out)
    w = _pad_axis(w, cp_out, 2).astype(compute_dtype)
    return {"w": w, "shift": shift.astype(jnp.float32)}


def pack_residual(p, compute_dtype):
    out = {
        "conv1": pack_conv(p["conv1_w"], p["bn1_scale"], p["bn1_shift"], compute_dtype),
        "conv2": pack_conv(p["conv2_w"], p["bn2_scale"], p["bn2_shift"], compute_dtype),
    }
    if "skip_w" in p:
        out["skip"] = pack_conv(p["skip_w"], p["skip_scale"], p["skip_shift"],
                                compute_dtype)
    return out


def pack_layer(blocks, compute_dtype):
    return [pack_residual(p, compute_dtype) for p in blocks]


def pack_hourglass(params, n, compute_dtype=jnp.bfloat16):
    out = {
        "up1": pack_layer(params["up1"], compute_dtype),
        "low1": pack_layer(params["low1"], compute_dtype),
        "low3": pack_layer(params["low3"], compute_dtype),
    }
    if n > 1:
        out["low2"] = pack_hourglass(params["low2"], n - 1, compute_dtype)
    else:
        out["low2"] = pack_layer(params["low2"], compute_dtype)
    return out


# ---------------------------------------------------------------------------
# parameter construction (deterministic, eval-mode BN folded to scale/shift)
# ---------------------------------------------------------------------------
def _init_bn(key, c):
    kg, kb, km, kv = jax.random.split(key, 4)
    gamma = 1.0 + 0.1 * jax.random.normal(kg, (c,), jnp.float32)
    beta = 0.1 * jax.random.normal(kb, (c,), jnp.float32)
    mean = 0.1 * jax.random.normal(km, (c,), jnp.float32)
    var = 1.0 + 0.1 * jax.random.uniform(kv, (c,), jnp.float32)
    scale = gamma / jnp.sqrt(var + BN_EPS)
    shift = beta - mean * scale
    return scale, shift


def _init_conv(key, c_out, c_in, k):
    return 0.1 * jax.random.normal(key, (c_out, c_in, k, k), jnp.float32)


def init_residual(key, inp_dim, out_dim):
    k1, k2, k3, k4, k5, k6 = jax.random.split(key, 6)
    p = {"conv1_w": _init_conv(k1, out_dim, inp_dim, 3),
         "conv2_w": _init_conv(k2, out_dim, out_dim, 3)}
    p["bn1_scale"], p["bn1_shift"] = _init_bn(k3, out_dim)
    p["bn2_scale"], p["bn2_shift"] = _init_bn(k4, out_dim)
    if inp_dim != out_dim:                   # stride is always 1 here
        p["skip_w"] = _init_conv(k5, out_dim, inp_dim, 1)
        p["skip_scale"], p["skip_shift"] = _init_bn(k6, out_dim)
    return p


def init_layer(key, inp_dim, out_dim, modules):
    keys = jax.random.split(key, modules)
    blocks = [init_residual(keys[0], inp_dim, out_dim)]
    for i in range(1, modules):
        blocks.append(init_residual(keys[i], out_dim, out_dim))
    return blocks


def init_layer_revr(key, inp_dim, out_dim, modules):
    keys = jax.random.split(key, modules)
    blocks = [init_residual(keys[i], inp_dim, inp_dim) for i in range(modules - 1)]
    blocks.append(init_residual(keys[modules - 1], inp_dim, out_dim))
    return blocks


def init_hourglass(key, n, dims, modules):
    k_up1, k_low1, k_low2, k_low3 = jax.random.split(key, 4)
    curr_mod, next_mod = modules[0], modules[1]
    curr_dim, next_dim = dims[0], dims[1]
    params = {
        "up1": init_layer(k_up1, curr_dim, curr_dim, curr_mod),
        "low1": init_layer(k_low1, curr_dim, next_dim, curr_mod),
        "low3": init_layer_revr(k_low3, next_dim, curr_dim, curr_mod),
    }
    if n > 1:
        params["low2"] = init_hourglass(k_low2, n - 1, dims[1:], modules[1:])
    else:
        params["low2"] = init_layer(k_low2, next_dim, next_dim, next_mod)
    return params


# ---------------------------------------------------------------------------
# plain-JAX (XLA, f32, NCHW) reference for the correctness check
# ---------------------------------------------------------------------------
def ref_conv_bn(x, w, scale, shift, relu=True, residual=None):
    pad = (w.shape[2] - 1) // 2
    y = jax.lax.conv_general_dilated(
        x, w, (1, 1), [(pad, pad), (pad, pad)],
        dimension_numbers=("NCHW", "OIHW", "NCHW"))
    y = y * scale[None, :, None, None] + shift[None, :, None, None]
    if residual is not None:
        y = y + residual
    return jnp.maximum(y, 0.0) if relu else y


def ref_residual(x, p):
    y1 = ref_conv_bn(x, p["conv1_w"], p["bn1_scale"], p["bn1_shift"], relu=True)
    if "skip_w" in p:
        skip = ref_conv_bn(x, p["skip_w"], p["skip_scale"], p["skip_shift"], relu=False)
    else:
        skip = x
    return ref_conv_bn(y1, p["conv2_w"], p["bn2_scale"], p["bn2_shift"],
                       relu=True, residual=skip)


def ref_layer(x, blocks):
    for p in blocks:
        x = ref_residual(x, p)
    return x


def ref_maxpool(x):
    N, C, H, W = x.shape
    return x.reshape(N, C, H // 2, 2, W // 2, 2).max(axis=(3, 5))


def ref_upsample(x):
    return jnp.repeat(jnp.repeat(x, 2, axis=2), 2, axis=3)


def ref_hourglass(x, params, n):
    up1 = ref_layer(x, params["up1"])
    max1 = ref_maxpool(x)
    low1 = ref_layer(max1, params["low1"])
    if n > 1:
        low2 = ref_hourglass(low1, params["low2"], n - 1)
    else:
        low2 = ref_layer(low1, params["low2"])
    low3 = ref_layer(low2, params["low3"])
    up2 = ref_upsample(low3)
    return up1 + up2


if __name__ == "__main__":
    # Hourglass(n=2, dims=[4, 8, 8], modules=[1, 1, 1]) at batch=2, 16x16 input.
    n = 2
    dims = [4, 8, 8]
    modules = [1, 1, 1]
    N, H, W = 2, 16, 16

    key = jax.random.PRNGKey(0)
    k_x, k_p = jax.random.split(key)
    x = jax.random.normal(k_x, (N, dims[0], H, W), dtype=jnp.float32)
    params = init_hourglass(k_p, n, dims, modules)

    packed = pack_hourglass(params, n)       # one-time weight fold / pack

    fwd = jax.jit(functools.partial(pallas_hourglass, n=n))
    out = jax.block_until_ready(fwd(x, packed))

    ref = ref_hourglass(x, params, n)
    assert out.shape == (N, dims[0], H, W), out.shape
    err = float(jnp.max(jnp.abs(out - ref)))
    ref_mag = float(jnp.max(jnp.abs(ref)))
    # bf16 MXU operands / f32 accumulation with f32 inter-layer activations:
    # a genuine indexing / BN-folding / residual-alignment bug produces errors
    # on the order of ref_mag; bf16 rounding stays well inside this bound.
    assert err <= 5e-2 * ref_mag + 5e-2, (err, ref_mag)
    print("KERNEL_OK")
</pallas_src>

<mosaic_0001>
module attributes {stable_mosaic.version = 11 : i64} {
  func.func @_conv_mm_kernel(%arg0: i32, %arg1: i32, %arg2: memref<256x128xbf16, #tpu.memory_space<vmem>>, %arg3: memref<128x128xbf16, #tpu.memory_space<vmem>>, %arg4: memref<1x128xf32, #tpu.memory_space<vmem>>, %arg5: memref<256x128xf32, #tpu.memory_space<vmem>>, %arg6: memref<256x128xf32, #tpu.memory_space<vmem>>) attributes {dimension_semantics = [#tpu.dimension_semantics<parallel>, #tpu.dimension_semantics<arbitrary>], iteration_bounds = array<i64: 2, 1>, scalar_prefetch = 0 : i64, scratch_operands = 1 : i64, tpu.core_type = #tpu.core_type<tc>, window_params = [{transform_indices = @transform_0, window_bounds = array<i64: 256, 128>}, {transform_indices = @transform_1, window_bounds = array<i64: 128, 128>}, {pipeline_mode = #tpu.pipeline_mode<synchronous>, transform_indices = @transform_2, window_bounds = array<i64: 1, 128>}, {transform_indices = @transform_3, window_bounds = array<i64: 256, 128>}]} {
    %c0_i32 = arith.constant 0 : i32
    %0 = arith.cmpi eq, %arg1, %c0_i32 : i32
    %1 = arith.extui %0 : i1 to i32
    %c0_i32_0 = arith.constant 0 : i32
    %2 = arith.cmpi ne, %1, %c0_i32_0 : i32
    scf.if %2 {
      %cst_10 = arith.constant 0.000000e+00 : f32
      %12 = vector.broadcast %cst_10 : f32 to vector<256x128xf32>
      %c0_11 = arith.constant 0 : index
      %c0_12 = arith.constant 0 : index
      %13 = vector.load %arg6[%c0_11, %c0_12] : memref<256x128xf32, #tpu.memory_space<vmem>>, vector<256x128xf32>
      tpu.vector_store %arg6[%c0_11, %c0_12], %12 {strides = array<i32>} : memref<256x128xf32, #tpu.memory_space<vmem>>, vector<256x128xf32>,
    } else {
    }
    %c0 = arith.constant 0 : index
    %c0_1 = arith.constant 0 : index
    %3 = vector.load %arg6[%c0, %c0_1] : memref<256x128xf32, #tpu.memory_space<vmem>>, vector<256x128xf32>
    %c0_2 = arith.constant 0 : index
    %c0_3 = arith.constant 0 : index
    %4 = vector.load %arg2[%c0_2, %c0_3] : memref<256x128xbf16, #tpu.memory_space<vmem>>, vector<256x128xbf16>
    %c0_4 = arith.constant 0 : index
    %c0_5 = arith.constant 0 : index
    %5 = vector.load %arg3[%c0_4, %c0_5] : memref<128x128xbf16, #tpu.memory_space<vmem>>, vector<128x128xbf16>
    %cst = arith.constant dense<0.000000e+00> : vector<256x128xf32>
    %6 = tpu.matmul %4, %5, %cst {dimension_numbers = #tpu.dot_dimension_numbers<[1], [0], [0], [1], [0, 0, 1, 1], [], []>} : vector<256x128xbf16>, vector<128x128xbf16>, vector<256x128xf32> -> vector<256x128xf32>
    %7 = arith.addf %3, %6 : vector<256x128xf32>
    %c0_6 = arith.constant 0 : index
    %c0_7 = arith.constant 0 : index
    %8 = vector.load %arg6[%c0_6, %c0_7] : memref<256x128xf32, #tpu.memory_space<vmem>>, vector<256x128xf32>
    tpu.vector_store %arg6[%c0_6, %c0_7], %7 {strides = array<i32>} : memref<256x128xf32, #tpu.memory_space<vmem>>, vector<256x128xf32>,
    %c0_i32_8 = arith.constant 0 : i32
    %9 = arith.cmpi eq, %arg1, %c0_i32_8 : i32
    %10 = arith.extui %9 : i1 to i32
    %c0_i32_9 = arith.constant 0 : i32
    %11 = arith.cmpi ne, %10, %c0_i32_9 : i32
    scf.if %11 {
      %c0_10 = arith.constant 0 : index
      %c0_11 = arith.constant 0 : index
      %12 = vector.load %arg6[%c0_10, %c0_11] : memref<256x128xf32, #tpu.memory_space<vmem>>, vector<256x128xf32>
      %c0_12 = arith.constant 0 : index
      %c0_13 = arith.constant 0 : index
      %13 = vector.load %arg4[%c0_12, %c0_13] : memref<1x128xf32, #tpu.memory_space<vmem>>, vector<1x128xf32>
      %14 = vector.broadcast %13 : vector<1x128xf32> to vector<256x128xf32>
      %15 = arith.addf %12, %14 : vector<256x128xf32>
      %cst_14 = arith.constant 0.000000e+00 : f32
      %16 = vector.broadcast %cst_14 : f32 to vector<256x128xf32>
      %17 = arith.maximumf %15, %16 : vector<256x128xf32>
      %c0_15 = arith.constant 0 : index
      %c0_16 = arith.constant 0 : index
      %18 = vector.load %arg5[%c0_15, %c0_16] : memref<256x128xf32, #tpu.memory_space<vmem>>, vector<256x128xf32>
      tpu.vector_store %arg5[%c0_15, %c0_16], %17 {strides = array<i32>} : memref<256x128xf32, #tpu.memory_space<vmem>>, vector<256x128xf32>,
    } else {
    }
    return
  }
  func.func @transform_0(%arg0: i32, %arg1: i32) -> (i32, i32) {
    %c0_i32 = arith.constant 0 : i32
    return %arg0, %arg1 : i32, i32
  }
  func.func @transform_1(%arg0: i32, %arg1: i32) -> (i32, i32) {
    %c0_i32 = arith.constant 0 : i32
    %c0_i32_0 = arith.constant 0 : i32
    return %arg1, %c0_i32 : i32, i32
  }
  func.func @transform_2(%arg0: i32, %arg1: i32) -> (i32, i32) {
    %c0_i32 = arith.constant 0 : i32
    %c0_i32_0 = arith.constant 0 : i32
    %c0_i32_1 = arith.constant 0 : i32
    return %c0_i32, %c0_i32_0 : i32, i32
  }
  func.func @transform_3(%arg0: i32, %arg1: i32) -> (i32, i32) {
    %c0_i32 = arith.constant 0 : i32
    %c0_i32_0 = arith.constant 0 : i32
    return %arg0, %c0_i32 : i32, i32
  }
}

module attributes {stable_mosaic.version = 11 : i64} {
  func.func @_conv_mm_kernel(%arg0: i32, %arg1: i32, %arg2: memref<256x128xbf16, #tpu.memory_space<vmem>>, %arg3: memref<128x128xbf16, #tpu.memory_space<vmem>>, %arg4: memref<1x128xf32, #tpu.memory_space<vmem>>, %arg5: memref<256x128xf32, #tpu.memory_space<vmem>>, %arg6: memref<256x128xf32, #tpu.memory_space<vmem>>, %arg7: memref<256x128xf32, #tpu.memory_space<vmem>>) attributes {dimension_semantics = [#tpu.dimension_semantics<parallel>, #tpu.dimension_semantics<arbitrary>], iteration_bounds = array<i64: 2, 1>, scalar_prefetch = 0 : i64, scratch_operands = 1 : i64, tpu.core_type = #tpu.core_type<tc>, window_params = [{transform_indices = @transform_0, window_bounds = array<i64: 256, 128>}, {transform_indices = @transform_1, window_bounds = array<i64: 128, 128>}, {pipeline_mode = #tpu.pipeline_mode<synchronous>, transform_indices = @transform_2, window_bounds = array<i64: 1, 128>}, {transform_indices = @transform_3, window_bounds = array<i64: 256, 128>}, {transform_indices = @transform_4, window_bounds = array<i64: 256, 128>}]} {
    %c0_i32 = arith.constant 0 : i32
    %0 = arith.cmpi eq, %arg1, %c0_i32 : i32
    %1 = arith.extui %0 : i1 to i32
    %c0_i32_0 = arith.constant 0 : i32
    %2 = arith.cmpi ne, %1, %c0_i32_0 : i32
    scf.if %2 {
      %cst_10 = arith.constant 0.000000e+00 : f32
      %12 = vector.broadcast %cst_10 : f32 to vector<256x128xf32>
      %c0_11 = arith.constant 0 : index
      %c0_12 = arith.constant 0 : index
      %13 = vector.load %arg7[%c0_11, %c0_12] : memref<256x128xf32, #tpu.memory_space<vmem>>, vector<256x128xf32>
      tpu.vector_store %arg7[%c0_11, %c0_12], %12 {strides = array<i32>} : memref<256x128xf32, #tpu.memory_space<vmem>>, vector<256x128xf32>,
    } else {
    }
    %c0 = arith.constant 0 : index
    %c0_1 = arith.constant 0 : index
    %3 = vector.load %arg7[%c0, %c0_1] : memref<256x128xf32, #tpu.memory_space<vmem>>, vector<256x128xf32>
    %c0_2 = arith.constant 0 : index
    %c0_3 = arith.constant 0 : index
    %4 = vector.load %arg2[%c0_2, %c0_3] : memref<256x128xbf16, #tpu.memory_space<vmem>>, vector<256x128xbf16>
    %c0_4 = arith.constant 0 : index
    %c0_5 = arith.constant 0 : index
    %5 = vector.load %arg3[%c0_4, %c0_5] : memref<128x128xbf16, #tpu.memory_space<vmem>>, vector<128x128xbf16>
    %cst = arith.constant dense<0.000000e+00> : vector<256x128xf32>
    %6 = tpu.matmul %4, %5, %cst {dimension_numbers = #tpu.dot_dimension_numbers<[1], [0], [0], [1], [0, 0, 1, 1], [], []>} : vector<256x128xbf16>, vector<128x128xbf16>, vector<256x128xf32> -> vector<256x128xf32>
    %7 = arith.addf %3, %6 : vector<256x128xf32>
    %c0_6 = arith.constant 0 : index
    %c0_7 = arith.constant 0 : index
    %8 = vector.load %arg7[%c0_6, %c0_7] : memref<256x128xf32, #tpu.memory_space<vmem>>, vector<256x128xf32>
    tpu.vector_store %arg7[%c0_6, %c0_7], %7 {strides = array<i32>} : memref<256x128xf32, #tpu.memory_space<vmem>>, vector<256x128xf32>,
    %c0_i32_8 = arith.constant 0 : i32
    %9 = arith.cmpi eq, %arg1, %c0_i32_8 : i32
    %10 = arith.extui %9 : i1 to i32
    %c0_i32_9 = arith.constant 0 : i32
    %11 = arith.cmpi ne, %10, %c0_i32_9 : i32
    scf.if %11 {
      %c0_10 = arith.constant 0 : index
      %c0_11 = arith.constant 0 : index
      %12 = vector.load %arg7[%c0_10, %c0_11] : memref<256x128xf32, #tpu.memory_space<vmem>>, vector<256x128xf32>
      %c0_12 = arith.constant 0 : index
      %c0_13 = arith.constant 0 : index
      %13 = vector.load %arg4[%c0_12, %c0_13] : memref<1x128xf32, #tpu.memory_space<vmem>>, vector<1x128xf32>
      %14 = vector.broadcast %13 : vector<1x128xf32> to vector<256x128xf32>
      %15 = arith.addf %12, %14 : vector<256x128xf32>
      %c0_14 = arith.constant 0 : index
      %c0_15 = arith.constant 0 : index
      %16 = vector.load %arg5[%c0_14, %c0_15] : memref<256x128xf32, #tpu.memory_space<vmem>>, vector<256x128xf32>
      %17 = arith.addf %15, %16 : vector<256x128xf32>
      %cst_16 = arith.constant 0.000000e+00 : f32
      %18 = vector.broadcast %cst_16 : f32 to vector<256x128xf32>
      %19 = arith.maximumf %17, %18 : vector<256x128xf32>
      %c0_17 = arith.constant 0 : index
      %c0_18 = arith.constant 0 : index
      %20 = vector.load %arg6[%c0_17, %c0_18] : memref<256x128xf32, #tpu.memory_space<vmem>>, vector<256x128xf32>
      tpu.vector_store %arg6[%c0_17, %c0_18], %19 {strides = array<i32>} : memref<256x128xf32, #tpu.memory_space<vmem>>, vector<256x128xf32>,
    } else {
    }
    return
  }
  func.func @transform_0(%arg0: i32, %arg1: i32) -> (i32, i32) {
    %c0_i32 = arith.constant 0 : i32
    return %arg0, %arg1 : i32, i32
  }
  func.func @transform_1(%arg0: i32, %arg1: i32) -> (i32, i32) {
    %c0_i32 = arith.constant 0 : i32
    %c0_i32_0 = arith.constant 0 : i32
    return %arg1, %c0_i32 : i32, i32
  }
  func.func @transform_2(%arg0: i32, %arg1: i32) -> (i32, i32) {
    %c0_i32 = arith.constant 0 : i32
    %c0_i32_0 = arith.constant 0 : i32
    %c0_i32_1 = arith.constant 0 : i32
    return %c0_i32, %c0_i32_0 : i32, i32
  }
  func.func @transform_3(%arg0: i32, %arg1: i32) -> (i32, i32) {
    %c0_i32 = arith.constant 0 : i32
    %c0_i32_0 = arith.constant 0 : i32
    return %arg0, %c0_i32 : i32, i32
  }
  func.func @transform_4(%arg0: i32, %arg1: i32) -> (i32, i32) {
    %c0_i32 = arith.constant 0 : i32
    %c0_i32_0 = arith.constant 0 : i32
    return %arg0, %c0_i32 : i32, i32
  }
}

module attributes {stable_mosaic.version = 11 : i64} {
  func.func @_conv_mm_kernel(%arg0: i32, %arg1: i32, %arg2: memref<128x128xbf16, #tpu.memory_space<vmem>>, %arg3: memref<128x128xbf16, #tpu.memory_space<vmem>>, %arg4: memref<1x128xf32, #tpu.memory_space<vmem>>, %arg5: memref<128x128xf32, #tpu.memory_space<vmem>>, %arg6: memref<128x128xf32, #tpu.memory_space<vmem>>) attributes {dimension_semantics = [#tpu.dimension_semantics<parallel>, #tpu.dimension_semantics<arbitrary>], iteration_bounds = array<i64: 1, 1>, scalar_prefetch = 0 : i64, scratch_operands = 1 : i64, tpu.core_type = #tpu.core_type<tc>, window_params = [{transform_indices = @transform_0, window_bounds = array<i64: 128, 128>}, {transform_indices = @transform_1, window_bounds = array<i64: 128, 128>}, {pipeline_mode = #tpu.pipeline_mode<synchronous>, transform_indices = @transform_2, window_bounds = array<i64: 1, 128>}, {transform_indices = @transform_3, window_bounds = array<i64: 128, 128>}]} {
    %c0_i32 = arith.constant 0 : i32
    %0 = arith.cmpi eq, %arg1, %c0_i32 : i32
    %1 = arith.extui %0 : i1 to i32
    %c0_i32_0 = arith.constant 0 : i32
    %2 = arith.cmpi ne, %1, %c0_i32_0 : i32
    scf.if %2 {
      %cst_10 = arith.constant 0.000000e+00 : f32
      %12 = vector.broadcast %cst_10 : f32 to vector<128x128xf32>
      %c0_11 = arith.constant 0 : index
      %c0_12 = arith.constant 0 : index
      %13 = vector.load %arg6[%c0_11, %c0_12] : memref<128x128xf32, #tpu.memory_space<vmem>>, vector<128x128xf32>
      tpu.vector_store %arg6[%c0_11, %c0_12], %12 {strides = array<i32>} : memref<128x128xf32, #tpu.memory_space<vmem>>, vector<128x128xf32>,
    } else {
    }
    %c0 = arith.constant 0 : index
    %c0_1 = arith.constant 0 : index
    %3 = vector.load %arg6[%c0, %c0_1] : memref<128x128xf32, #tpu.memory_space<vmem>>, vector<128x128xf32>
    %c0_2 = arith.constant 0 : index
    %c0_3 = arith.constant 0 : index
    %4 = vector.load %arg2[%c0_2, %c0_3] : memref<128x128xbf16, #tpu.memory_space<vmem>>, vector<128x128xbf16>
    %c0_4 = arith.constant 0 : index
    %c0_5 = arith.constant 0 : index
    %5 = vector.load %arg3[%c0_4, %c0_5] : memref<128x128xbf16, #tpu.memory_space<vmem>>, vector<128x128xbf16>
    %cst = arith.constant dense<0.000000e+00> : vector<128x128xf32>
    %6 = tpu.matmul %4, %5, %cst {dimension_numbers = #tpu.dot_dimension_numbers<[1], [0], [0], [1], [0, 0, 1, 1], [], []>} : vector<128x128xbf16>, vector<128x128xbf16>, vector<128x128xf32> -> vector<128x128xf32>
    %7 = arith.addf %3, %6 : vector<128x128xf32>
    %c0_6 = arith.constant 0 : index
    %c0_7 = arith.constant 0 : index
    %8 = vector.load %arg6[%c0_6, %c0_7] : memref<128x128xf32, #tpu.memory_space<vmem>>, vector<128x128xf32>
    tpu.vector_store %arg6[%c0_6, %c0_7], %7 {strides = array<i32>} : memref<128x128xf32, #tpu.memory_space<vmem>>, vector<128x128xf32>,
    %c0_i32_8 = arith.constant 0 : i32
    %9 = arith.cmpi eq, %arg1, %c0_i32_8 : i32
    %10 = arith.extui %9 : i1 to i32
    %c0_i32_9 = arith.constant 0 : i32
    %11 = arith.cmpi ne, %10, %c0_i32_9 : i32
    scf.if %11 {
      %c0_10 = arith.constant 0 : index
      %c0_11 = arith.constant 0 : index
      %12 = vector.load %arg6[%c0_10, %c0_11] : memref<128x128xf32, #tpu.memory_space<vmem>>, vector<128x128xf32>
      %c0_12 = arith.constant 0 : index
      %c0_13 = arith.constant 0 : index
      %13 = vector.load %arg4[%c0_12, %c0_13] : memref<1x128xf32, #tpu.memory_space<vmem>>, vector<1x128xf32>
      %14 = vector.broadcast %13 : vector<1x128xf32> to vector<128x128xf32>
      %15 = arith.addf %12, %14 : vector<128x128xf32>
      %cst_14 = arith.constant 0.000000e+00 : f32
      %16 = vector.broadcast %cst_14 : f32 to vector<128x128xf32>
      %17 = arith.maximumf %15, %16 : vector<128x128xf32>
      %c0_15 = arith.constant 0 : index
      %c0_16 = arith.constant 0 : index
      %18 = vector.load %arg5[%c0_15, %c0_16] : memref<128x128xf32, #tpu.memory_space<vmem>>, vector<128x128xf32>
      tpu.vector_store %arg5[%c0_15, %c0_16], %17 {strides = array<i32>} : memref<128x128xf32, #tpu.memory_space<vmem>>, vector<128x128xf32>,
    } else {
    }
    return
  }
  func.func @transform_0(%arg0: i32, %arg1: i32) -> (i32, i32) {
    %c0_i32 = arith.constant 0 : i32
    return %arg0, %arg1 : i32, i32
  }
  func.func @transform_1(%arg0: i32, %arg1: i32) -> (i32, i32) {
    %c0_i32 = arith.constant 0 : i32
    %c0_i32_0 = arith.constant 0 : i32
    return %arg1, %c0_i32 : i32, i32
  }
  func.func @transform_2(%arg0: i32, %arg1: i32) -> (i32, i32) {
    %c0_i32 = arith.constant 0 : i32
    %c0_i32_0 = arith.constant 0 : i32
    %c0_i32_1 = arith.constant 0 : i32
    return %c0_i32, %c0_i32_0 : i32, i32
  }
  func.func @transform_3(%arg0: i32, %arg1: i32) -> (i32, i32) {
    %c0_i32 = arith.constant 0 : i32
    %c0_i32_0 = arith.constant 0 : i32
    return %arg0, %c0_i32 : i32, i32
  }
}

module attributes {stable_mosaic.version = 11 : i64} {
  func.func @_conv_mm_kernel(%arg0: i32, %arg1: i32, %arg2: memref<128x128xbf16, #tpu.memory_space<vmem>>, %arg3: memref<128x128xbf16, #tpu.memory_space<vmem>>, %arg4: memref<1x128xf32, #tpu.memory_space<vmem>>, %arg5: memref<128x128xf32, #tpu.memory_space<vmem>>, %arg6: memref<128x128xf32, #tpu.memory_space<vmem>>) attributes {dimension_semantics = [#tpu.dimension_semantics<parallel>, #tpu.dimension_semantics<arbitrary>], iteration_bounds = array<i64: 1, 1>, scalar_prefetch = 0 : i64, scratch_operands = 1 : i64, tpu.core_type = #tpu.core_type<tc>, window_params = [{transform_indices = @transform_0, window_bounds = array<i64: 128, 128>}, {transform_indices = @transform_1, window_bounds = array<i64: 128, 128>}, {pipeline_mode = #tpu.pipeline_mode<synchronous>, transform_indices = @transform_2, window_bounds = array<i64: 1, 128>}, {transform_indices = @transform_3, window_bounds = array<i64: 128, 128>}]} {
    %c0_i32 = arith.constant 0 : i32
    %0 = arith.cmpi eq, %arg1, %c0_i32 : i32
    %1 = arith.extui %0 : i1 to i32
    %c0_i32_0 = arith.constant 0 : i32
    %2 = arith.cmpi ne, %1, %c0_i32_0 : i32
    scf.if %2 {
      %cst_10 = arith.constant 0.000000e+00 : f32
      %12 = vector.broadcast %cst_10 : f32 to vector<128x128xf32>
      %c0_11 = arith.constant 0 : index
      %c0_12 = arith.constant 0 : index
      %13 = vector.load %arg6[%c0_11, %c0_12] : memref<128x128xf32, #tpu.memory_space<vmem>>, vector<128x128xf32>
      tpu.vector_store %arg6[%c0_11, %c0_12], %12 {strides = array<i32>} : memref<128x128xf32, #tpu.memory_space<vmem>>, vector<128x128xf32>,
    } else {
    }
    %c0 = arith.constant 0 : index
    %c0_1 = arith.constant 0 : index
    %3 = vector.load %arg6[%c0, %c0_1] : memref<128x128xf32, #tpu.memory_space<vmem>>, vector<128x128xf32>
    %c0_2 = arith.constant 0 : index
    %c0_3 = arith.constant 0 : index
    %4 = vector.load %arg2[%c0_2, %c0_3] : memref<128x128xbf16, #tpu.memory_space<vmem>>, vector<128x128xbf16>
    %c0_4 = arith.constant 0 : index
    %c0_5 = arith.constant 0 : index
    %5 = vector.load %arg3[%c0_4, %c0_5] : memref<128x128xbf16, #tpu.memory_space<vmem>>, vector<128x128xbf16>
    %cst = arith.constant dense<0.000000e+00> : vector<128x128xf32>
    %6 = tpu.matmul %4, %5, %cst {dimension_numbers = #tpu.dot_dimension_numbers<[1], [0], [0], [1], [0, 0, 1, 1], [], []>} : vector<128x128xbf16>, vector<128x128xbf16>, vector<128x128xf32> -> vector<128x128xf32>
    %7 = arith.addf %3, %6 : vector<128x128xf32>
    %c0_6 = arith.constant 0 : index
    %c0_7 = arith.constant 0 : index
    %8 = vector.load %arg6[%c0_6, %c0_7] : memref<128x128xf32, #tpu.memory_space<vmem>>, vector<128x128xf32>
    tpu.vector_store %arg6[%c0_6, %c0_7], %7 {strides = array<i32>} : memref<128x128xf32, #tpu.memory_space<vmem>>, vector<128x128xf32>,
    %c0_i32_8 = arith.constant 0 : i32
    %9 = arith.cmpi eq, %arg1, %c0_i32_8 : i32
    %10 = arith.extui %9 : i1 to i32
    %c0_i32_9 = arith.constant 0 : i32
    %11 = arith.cmpi ne, %10, %c0_i32_9 : i32
    scf.if %11 {
      %c0_10 = arith.constant 0 : index
      %c0_11 = arith.constant 0 : index
      %12 = vector.load %arg6[%c0_10, %c0_11] : memref<128x128xf32, #tpu.memory_space<vmem>>, vector<128x128xf32>
      %c0_12 = arith.constant 0 : index
      %c0_13 = arith.constant 0 : index
      %13 = vector.load %arg4[%c0_12, %c0_13] : memref<1x128xf32, #tpu.memory_space<vmem>>, vector<1x128xf32>
      %14 = vector.broadcast %13 : vector<1x128xf32> to vector<128x128xf32>
      %15 = arith.addf %12, %14 : vector<128x128xf32>
      %c0_14 = arith.constant 0 : index
      %c0_15 = arith.constant 0 : index
      %16 = vector.load %arg5[%c0_14, %c0_15] : memref<128x128xf32, #tpu.memory_space<vmem>>, vector<128x128xf32>
      tpu.vector_store %arg5[%c0_14, %c0_15], %15 {strides = array<i32>} : memref<128x128xf32, #tpu.memory_space<vmem>>, vector<128x128xf32>,
    } else {
    }
    return
  }
  func.func @transform_0(%arg0: i32, %arg1: i32) -> (i32, i32) {
    %c0_i32 = arith.constant 0 : i32
    return %arg0, %arg1 : i32, i32
  }
  func.func @transform_1(%arg0: i32, %arg1: i32) -> (i32, i32) {
    %c0_i32 = arith.constant 0 : i32
    %c0_i32_0 = arith.constant 0 : i32
    return %arg1, %c0_i32 : i32, i32
  }
  func.func @transform_2(%arg0: i32, %arg1: i32) -> (i32, i32) {
    %c0_i32 = arith.constant 0 : i32
    %c0_i32_0 = arith.constant 0 : i32
    %c0_i32_1 = arith.constant 0 : i32
    return %c0_i32, %c0_i32_0 : i32, i32
  }
  func.func @transform_3(%arg0: i32, %arg1: i32) -> (i32, i32) {
    %c0_i32 = arith.constant 0 : i32
    %c0_i32_0 = arith.constant 0 : i32
    return %arg0, %c0_i32 : i32, i32
  }
}

module attributes {stable_mosaic.version = 11 : i64} {
  func.func @_conv_mm_kernel(%arg0: i32, %arg1: i32, %arg2: memref<128x128xbf16, #tpu.memory_space<vmem>>, %arg3: memref<128x128xbf16, #tpu.memory_space<vmem>>, %arg4: memref<1x128xf32, #tpu.memory_space<vmem>>, %arg5: memref<128x128xf32, #tpu.memory_space<vmem>>, %arg6: memref<128x128xf32, #tpu.memory_space<vmem>>, %arg7: memref<128x128xf32, #tpu.memory_space<vmem>>) attributes {dimension_semantics = [#tpu.dimension_semantics<parallel>, #tpu.dimension_semantics<arbitrary>], iteration_bounds = array<i64: 1, 1>, scalar_prefetch = 0 : i64, scratch_operands = 1 : i64, tpu.core_type = #tpu.core_type<tc>, window_params = [{transform_indices = @transform_0, window_bounds = array<i64: 128, 128>}, {transform_indices = @transform_1, window_bounds = array<i64: 128, 128>}, {pipeline_mode = #tpu.pipeline_mode<synchronous>, transform_indices = @transform_2, window_bounds = array<i64: 1, 128>}, {transform_indices = @transform_3, window_bounds = array<i64: 128, 128>}, {transform_indices = @transform_4, window_bounds = array<i64: 128, 128>}]} {
    %c0_i32 = arith.constant 0 : i32
    %0 = arith.cmpi eq, %arg1, %c0_i32 : i32
    %1 = arith.extui %0 : i1 to i32
    %c0_i32_0 = arith.constant 0 : i32
    %2 = arith.cmpi ne, %1, %c0_i32_0 : i32
    scf.if %2 {
      %cst_10 = arith.constant 0.000000e+00 : f32
      %12 = vector.broadcast %cst_10 : f32 to vector<128x128xf32>
      %c0_11 = arith.constant 0 : index
      %c0_12 = arith.constant 0 : index
      %13 = vector.load %arg7[%c0_11, %c0_12] : memref<128x128xf32, #tpu.memory_space<vmem>>, vector<128x128xf32>
      tpu.vector_store %arg7[%c0_11, %c0_12], %12 {strides = array<i32>} : memref<128x128xf32, #tpu.memory_space<vmem>>, vector<128x128xf32>,
    } else {
    }
    %c0 = arith.constant 0 : index
    %c0_1 = arith.constant 0 : index
    %3 = vector.load %arg7[%c0, %c0_1] : memref<128x128xf32, #tpu.memory_space<vmem>>, vector<128x128xf32>
    %c0_2 = arith.constant 0 : index
    %c0_3 = arith.constant 0 : index
    %4 = vector.load %arg2[%c0_2, %c0_3] : memref<128x128xbf16, #tpu.memory_space<vmem>>, vector<128x128xbf16>
    %c0_4 = arith.constant 0 : index
    %c0_5 = arith.constant 0 : index
    %5 = vector.load %arg3[%c0_4, %c0_5] : memref<128x128xbf16, #tpu.memory_space<vmem>>, vector<128x128xbf16>
    %cst = arith.constant dense<0.000000e+00> : vector<128x128xf32>
    %6 = tpu.matmul %4, %5, %cst {dimension_numbers = #tpu.dot_dimension_numbers<[1], [0], [0], [1], [0, 0, 1, 1], [], []>} : vector<128x128xbf16>, vector<128x128xbf16>, vector<128x128xf32> -> vector<128x128xf32>
    %7 = arith.addf %3, %6 : vector<128x128xf32>
    %c0_6 = arith.constant 0 : index
    %c0_7 = arith.constant 0 : index
    %8 = vector.load %arg7[%c0_6, %c0_7] : memref<128x128xf32, #tpu.memory_space<vmem>>, vector<128x128xf32>
    tpu.vector_store %arg7[%c0_6, %c0_7], %7 {strides = array<i32>} : memref<128x128xf32, #tpu.memory_space<vmem>>, vector<128x128xf32>,
    %c0_i32_8 = arith.constant 0 : i32
    %9 = arith.cmpi eq, %arg1, %c0_i32_8 : i32
    %10 = arith.extui %9 : i1 to i32
    %c0_i32_9 = arith.constant 0 : i32
    %11 = arith.cmpi ne, %10, %c0_i32_9 : i32
    scf.if %11 {
      %c0_10 = arith.constant 0 : index
      %c0_11 = arith.constant 0 : index
      %12 = vector.load %arg7[%c0_10, %c0_11] : memref<128x128xf32, #tpu.memory_space<vmem>>, vector<128x128xf32>
      %c0_12 = arith.constant 0 : index
      %c0_13 = arith.constant 0 : index
      %13 = vector.load %arg4[%c0_12, %c0_13] : memref<1x128xf32, #tpu.memory_space<vmem>>, vector<1x128xf32>
      %14 = vector.broadcast %13 : vector<1x128xf32> to vector<128x128xf32>
      %15 = arith.addf %12, %14 : vector<128x128xf32>
      %c0_14 = arith.constant 0 : index
      %c0_15 = arith.constant 0 : index
      %16 = vector.load %arg5[%c0_14, %c0_15] : memref<128x128xf32, #tpu.memory_space<vmem>>, vector<128x128xf32>
      %17 = arith.addf %15, %16 : vector<128x128xf32>
      %cst_16 = arith.constant 0.000000e+00 : f32
      %18 = vector.broadcast %cst_16 : f32 to vector<128x128xf32>
      %19 = arith.maximumf %17, %18 : vector<128x128xf32>
      %c0_17 = arith.constant 0 : index
      %c0_18 = arith.constant 0 : index
      %20 = vector.load %arg6[%c0_17, %c0_18] : memref<128x128xf32, #tpu.memory_space<vmem>>, vector<128x128xf32>
      tpu.vector_store %arg6[%c0_17, %c0_18], %19 {strides = array<i32>} : memref<128x128xf32, #tpu.memory_space<vmem>>, vector<128x128xf32>,
    } else {
    }
    return
  }
  func.func @transform_0(%arg0: i32, %arg1: i32) -> (i32, i32) {
    %c0_i32 = arith.constant 0 : i32
    return %arg0, %arg1 : i32, i32
  }
  func.func @transform_1(%arg0: i32, %arg1: i32) -> (i32, i32) {
    %c0_i32 = arith.constant 0 : i32
    %c0_i32_0 = arith.constant 0 : i32
    return %arg1, %c0_i32 : i32, i32
  }
  func.func @transform_2(%arg0: i32, %arg1: i32) -> (i32, i32) {
    %c0_i32 = arith.constant 0 : i32
    %c0_i32_0 = arith.constant 0 : i32
    %c0_i32_1 = arith.constant 0 : i32
    return %c0_i32, %c0_i32_0 : i32, i32
  }
  func.func @transform_3(%arg0: i32, %arg1: i32) -> (i32, i32) {
    %c0_i32 = arith.constant 0 : i32
    %c0_i32_0 = arith.constant 0 : i32
    return %arg0, %c0_i32 : i32, i32
  }
  func.func @transform_4(%arg0: i32, %arg1: i32) -> (i32, i32) {
    %c0_i32 = arith.constant 0 : i32
    %c0_i32_0 = arith.constant 0 : i32
    return %arg0, %c0_i32 : i32, i32
  }
}

module attributes {stable_mosaic.version = 11 : i64} {
  func.func @_conv_mm_kernel(%arg0: i32, %arg1: i32, %arg2: memref<32x128xbf16, #tpu.memory_space<vmem>>, %arg3: memref<128x128xbf16, #tpu.memory_space<vmem>>, %arg4: memref<1x128xf32, #tpu.memory_space<vmem>>, %arg5: memref<32x128xf32, #tpu.memory_space<vmem>>, %arg6: memref<32x128xf32, #tpu.memory_space<vmem>>) attributes {dimension_semantics = [#tpu.dimension_semantics<parallel>, #tpu.dimension_semantics<arbitrary>], iteration_bounds = array<i64: 1, 1>, scalar_prefetch = 0 : i64, scratch_operands = 1 : i64, tpu.core_type = #tpu.core_type<tc>, window_params = [{transform_indices = @transform_0, window_bounds = array<i64: 32, 128>}, {transform_indices = @transform_1, window_bounds = array<i64: 128, 128>}, {pipeline_mode = #tpu.pipeline_mode<synchronous>, transform_indices = @transform_2, window_bounds = array<i64: 1, 128>}, {transform_indices = @transform_3, window_bounds = array<i64: 32, 128>}]} {
    %c0_i32 = arith.constant 0 : i32
    %0 = arith.cmpi eq, %arg1, %c0_i32 : i32
    %1 = arith.extui %0 : i1 to i32
    %c0_i32_0 = arith.constant 0 : i32
    %2 = arith.cmpi ne, %1, %c0_i32_0 : i32
    scf.if %2 {
      %cst_10 = arith.constant 0.000000e+00 : f32
      %12 = vector.broadcast %cst_10 : f32 to vector<32x128xf32>
      %c0_11 = arith.constant 0 : index
      %c0_12 = arith.constant 0 : index
      %13 = vector.load %arg6[%c0_11, %c0_12] : memref<32x128xf32, #tpu.memory_space<vmem>>, vector<32x128xf32>
      tpu.vector_store %arg6[%c0_11, %c0_12], %12 {strides = array<i32>} : memref<32x128xf32, #tpu.memory_space<vmem>>, vector<32x128xf32>,
    } else {
    }
    %c0 = arith.constant 0 : index
    %c0_1 = arith.constant 0 : index
    %3 = vector.load %arg6[%c0, %c0_1] : memref<32x128xf32, #tpu.memory_space<vmem>>, vector<32x128xf32>
    %c0_2 = arith.constant 0 : index
    %c0_3 = arith.constant 0 : index
    %4 = vector.load %arg2[%c0_2, %c0_3] : memref<32x128xbf16, #tpu.memory_space<vmem>>, vector<32x128xbf16>
    %c0_4 = arith.constant 0 : index
    %c0_5 = arith.constant 0 : index
    %5 = vector.load %arg3[%c0_4, %c0_5] : memref<128x128xbf16, #tpu.memory_space<vmem>>, vector<128x128xbf16>
    %cst = arith.constant dense<0.000000e+00> : vector<32x128xf32>
    %6 = tpu.matmul %4, %5, %cst {dimension_numbers = #tpu.dot_dimension_numbers<[1], [0], [0], [1], [0, 0, 1, 1], [], []>} : vector<32x128xbf16>, vector<128x128xbf16>, vector<32x128xf32> -> vector<32x128xf32>
    %7 = arith.addf %3, %6 : vector<32x128xf32>
    %c0_6 = arith.constant 0 : index
    %c0_7 = arith.constant 0 : index
    %8 = vector.load %arg6[%c0_6, %c0_7] : memref<32x128xf32, #tpu.memory_space<vmem>>, vector<32x128xf32>
    tpu.vector_store %arg6[%c0_6, %c0_7], %7 {strides = array<i32>} : memref<32x128xf32, #tpu.memory_space<vmem>>, vector<32x128xf32>,
    %c0_i32_8 = arith.constant 0 : i32
    %9 = arith.cmpi eq, %arg1, %c0_i32_8 : i32
    %10 = arith.extui %9 : i1 to i32
    %c0_i32_9 = arith.constant 0 : i32
    %11 = arith.cmpi ne, %10, %c0_i32_9 : i32
    scf.if %11 {
      %c0_10 = arith.constant 0 : index
      %c0_11 = arith.constant 0 : index
      %12 = vector.load %arg6[%c0_10, %c0_11] : memref<32x128xf32, #tpu.memory_space<vmem>>, vector<32x128xf32>
      %c0_12 = arith.constant 0 : index
      %c0_13 = arith.constant 0 : index
      %13 = vector.load %arg4[%c0_12, %c0_13] : memref<1x128xf32, #tpu.memory_space<vmem>>, vector<1x128xf32>
      %14 = vector.broadcast %13 : vector<1x128xf32> to vector<32x128xf32>
      %15 = arith.addf %12, %14 : vector<32x128xf32>
      %cst_14 = arith.constant 0.000000e+00 : f32
      %16 = vector.broadcast %cst_14 : f32 to vector<32x128xf32>
      %17 = arith.maximumf %15, %16 : vector<32x128xf32>
      %c0_15 = arith.constant 0 : index
      %c0_16 = arith.constant 0 : index
      %18 = vector.load %arg5[%c0_15, %c0_16] : memref<32x128xf32, #tpu.memory_space<vmem>>, vector<32x128xf32>
      tpu.vector_store %arg5[%c0_15, %c0_16], %17 {strides = array<i32>} : memref<32x128xf32, #tpu.memory_space<vmem>>, vector<32x128xf32>,
    } else {
    }
    return
  }
  func.func @transform_0(%arg0: i32, %arg1: i32) -> (i32, i32) {
    %c0_i32 = arith.constant 0 : i32
    return %arg0, %arg1 : i32, i32
  }
  func.func @transform_1(%arg0: i32, %arg1: i32) -> (i32, i32) {
    %c0_i32 = arith.constant 0 : i32
    %c0_i32_0 = arith.constant 0 : i32
    return %arg1, %c0_i32 : i32, i32
  }
  func.func @transform_2(%arg0: i32, %arg1: i32) -> (i32, i32) {
    %c0_i32 = arith.constant 0 : i32
    %c0_i32_0 = arith.constant 0 : i32
    %c0_i32_1 = arith.constant 0 : i32
    return %c0_i32, %c0_i32_0 : i32, i32
  }
  func.func @transform_3(%arg0: i32, %arg1: i32) -> (i32, i32) {
    %c0_i32 = arith.constant 0 : i32
    %c0_i32_0 = arith.constant 0 : i32
    return %arg0, %c0_i32 : i32, i32
  }
}

module attributes {stable_mosaic.version = 11 : i64} {
  func.func @_conv_mm_kernel(%arg0: i32, %arg1: i32, %arg2: memref<32x128xbf16, #tpu.memory_space<vmem>>, %arg3: memref<128x128xbf16, #tpu.memory_space<vmem>>, %arg4: memref<1x128xf32, #tpu.memory_space<vmem>>, %arg5: memref<32x128xf32, #tpu.memory_space<vmem>>, %arg6: memref<32x128xf32, #tpu.memory_space<vmem>>, %arg7: memref<32x128xf32, #tpu.memory_space<vmem>>) attributes {dimension_semantics = [#tpu.dimension_semantics<parallel>, #tpu.dimension_semantics<arbitrary>], iteration_bounds = array<i64: 1, 1>, scalar_prefetch = 0 : i64, scratch_operands = 1 : i64, tpu.core_type = #tpu.core_type<tc>, window_params = [{transform_indices = @transform_0, window_bounds = array<i64: 32, 128>}, {transform_indices = @transform_1, window_bounds = array<i64: 128, 128>}, {pipeline_mode = #tpu.pipeline_mode<synchronous>, transform_indices = @transform_2, window_bounds = array<i64: 1, 128>}, {transform_indices = @transform_3, window_bounds = array<i64: 32, 128>}, {transform_indices = @transform_4, window_bounds = array<i64: 32, 128>}]} {
    %c0_i32 = arith.constant 0 : i32
    %0 = arith.cmpi eq, %arg1, %c0_i32 : i32
    %1 = arith.extui %0 : i1 to i32
    %c0_i32_0 = arith.constant 0 : i32
    %2 = arith.cmpi ne, %1, %c0_i32_0 : i32
    scf.if %2 {
      %cst_10 = arith.constant 0.000000e+00 : f32
      %12 = vector.broadcast %cst_10 : f32 to vector<32x128xf32>
      %c0_11 = arith.constant 0 : index
      %c0_12 = arith.constant 0 : index
      %13 = vector.load %arg7[%c0_11, %c0_12] : memref<32x128xf32, #tpu.memory_space<vmem>>, vector<32x128xf32>
      tpu.vector_store %arg7[%c0_11, %c0_12], %12 {strides = array<i32>} : memref<32x128xf32, #tpu.memory_space<vmem>>, vector<32x128xf32>,
    } else {
    }
    %c0 = arith.constant 0 : index
    %c0_1 = arith.constant 0 : index
    %3 = vector.load %arg7[%c0, %c0_1] : memref<32x128xf32, #tpu.memory_space<vmem>>, vector<32x128xf32>
    %c0_2 = arith.constant 0 : index
    %c0_3 = arith.constant 0 : index
    %4 = vector.load %arg2[%c0_2, %c0_3] : memref<32x128xbf16, #tpu.memory_space<vmem>>, vector<32x128xbf16>
    %c0_4 = arith.constant 0 : index
    %c0_5 = arith.constant 0 : index
    %5 = vector.load %arg3[%c0_4, %c0_5] : memref<128x128xbf16, #tpu.memory_space<vmem>>, vector<128x128xbf16>
    %cst = arith.constant dense<0.000000e+00> : vector<32x128xf32>
    %6 = tpu.matmul %4, %5, %cst {dimension_numbers = #tpu.dot_dimension_numbers<[1], [0], [0], [1], [0, 0, 1, 1], [], []>} : vector<32x128xbf16>, vector<128x128xbf16>, vector<32x128xf32> -> vector<32x128xf32>
    %7 = arith.addf %3, %6 : vector<32x128xf32>
    %c0_6 = arith.constant 0 : index
    %c0_7 = arith.constant 0 : index
    %8 = vector.load %arg7[%c0_6, %c0_7] : memref<32x128xf32, #tpu.memory_space<vmem>>, vector<32x128xf32>
    tpu.vector_store %arg7[%c0_6, %c0_7], %7 {strides = array<i32>} : memref<32x128xf32, #tpu.memory_space<vmem>>, vector<32x128xf32>,
    %c0_i32_8 = arith.constant 0 : i32
    %9 = arith.cmpi eq, %arg1, %c0_i32_8 : i32
    %10 = arith.extui %9 : i1 to i32
    %c0_i32_9 = arith.constant 0 : i32
    %11 = arith.cmpi ne, %10, %c0_i32_9 : i32
    scf.if %11 {
      %c0_10 = arith.constant 0 : index
      %c0_11 = arith.constant 0 : index
      %12 = vector.load %arg7[%c0_10, %c0_11] : memref<32x128xf32, #tpu.memory_space<vmem>>, vector<32x128xf32>
      %c0_12 = arith.constant 0 : index
      %c0_13 = arith.constant 0 : index
      %13 = vector.load %arg4[%c0_12, %c0_13] : memref<1x128xf32, #tpu.memory_space<vmem>>, vector<1x128xf32>
      %14 = vector.broadcast %13 : vector<1x128xf32> to vector<32x128xf32>
      %15 = arith.addf %12, %14 : vector<32x128xf32>
      %c0_14 = arith.constant 0 : index
      %c0_15 = arith.constant 0 : index
      %16 = vector.load %arg5[%c0_14, %c0_15] : memref<32x128xf32, #tpu.memory_space<vmem>>, vector<32x128xf32>
      %17 = arith.addf %15, %16 : vector<32x128xf32>
      %cst_16 = arith.constant 0.000000e+00 : f32
      %18 = vector.broadcast %cst_16 : f32 to vector<32x128xf32>
      %19 = arith.maximumf %17, %18 : vector<32x128xf32>
      %c0_17 = arith.constant 0 : index
      %c0_18 = arith.constant 0 : index
      %20 = vector.load %arg6[%c0_17, %c0_18] : memref<32x128xf32, #tpu.memory_space<vmem>>, vector<32x128xf32>
      tpu.vector_store %arg6[%c0_17, %c0_18], %19 {strides = array<i32>} : memref<32x128xf32, #tpu.memory_space<vmem>>, vector<32x128xf32>,
    } else {
    }
    return
  }
  func.func @transform_0(%arg0: i32, %arg1: i32) -> (i32, i32) {
    %c0_i32 = arith.constant 0 : i32
    return %arg0, %arg1 : i32, i32
  }
  func.func @transform_1(%arg0: i32, %arg1: i32) -> (i32, i32) {
    %c0_i32 = arith.constant 0 : i32
    %c0_i32_0 = arith.constant 0 : i32
    return %arg1, %c0_i32 : i32, i32
  }
  func.func @transform_2(%arg0: i32, %arg1: i32) -> (i32, i32) {
    %c0_i32 = arith.constant 0 : i32
    %c0_i32_0 = arith.constant 0 : i32
    %c0_i32_1 = arith.constant 0 : i32
    return %c0_i32, %c0_i32_0 : i32, i32
  }
  func.func @transform_3(%arg0: i32, %arg1: i32) -> (i32, i32) {
    %c0_i32 = arith.constant 0 : i32
    %c0_i32_0 = arith.constant 0 : i32
    return %arg0, %c0_i32 : i32, i32
  }
  func.func @transform_4(%arg0: i32, %arg1: i32) -> (i32, i32) {
    %c0_i32 = arith.constant 0 : i32
    %c0_i32_0 = arith.constant 0 : i32
    return %arg0, %c0_i32 : i32, i32
  }
}

</mosaic_0001>

<bundles_post_ra>
// kernel: pallas_hourglass.16
= control target key start
LH: loop header
LB: loop body
LE: loop exit
PB: predicated region body
PF: predicated region fallthrough
CT: control target
= control target key end

     0   :  { %s1143_s12 = smov 0   ;;  %s1145_s13 = smov 0   ;;  %s1293_s0 = inlined_call_operand.vmem [shape: bf16[512,128], index: 0, kind: input, shape index: {}]   ;;  %s1294_s1 = inlined_call_operand.vmem [shape: bf16[128,128], index: 1, kind: input, shape index: {}]   ;;  %s1295_s2 = inlined_call_operand.vmem [shape: f32[1,128], index: 2, kind: input, shape index: {}]   ;;  %s1296_s3 = inlined_call_operand.vmem [shape: f32[512,128], index: 3, kind: output, shape index: {}]  }
   0x1   :  { %s1147_s14 = smov 0  }
   0x2 LB: > { %s25_s15 = sadd.s32 1, %s1117_s13  ;;  %p931_p0 = scmp.ge.s32.totalorder %s1121_s14, 1  ;;  %s1121_s14 = sphi %s1147_s14, %s13_s14   ;;  %s1117_s13 = sphi %s1145_s13, %s1298_s13   ;;  %s1113_s12 = sphi %s1143_s12, %s1297_s12  }
   0x3   : > { %p27_p1 = scmp.ge.s32.totalorder %s25_s15, 2  ;;  %p166_p2 = scmp.lt.s32.totalorder %s1121_s14, 3 }
   0x5   : > { %s1300_s15 = smov (%p27_p1, %s25_s15), 0  ;;  %p167_p3 = pnand %p931_p0, %p166_p2 }
   0x6   : > { %s932_s18 = sshll.u32 (!%p167_p3), %s1113_s12, 5 }
   0x7   : > { %170 = sbr.rel (%p167_p3) target bundleno = 273 (0x111), region = 32  ;;  %p199_p4 = scmp.lt.s32.totalorder (!%p167_p3), %s932_s18, 63 }
   0xc   : > { %v1075_v0 = vld [vmem:[%s1294_s1 + $0x38] sm:$0xff]   ;;  %v1076_v1 = vld [vmem:[%s1294_s1 + $0x30] sm:$0xff]   ;;  %s1302_s18 = smov (!%p199_p4, %s932_s18), 63  ;;  %v1077_v2 = vld [vmem:[%s1294_s1 + $0x28] sm:$0xff]  }
   0xd   : > { %987 = vmatprep.subr.bf16.mxu0 %v1075_v0  ;;  %1035 = vmatprep.subr.bf16.mxu1 %v1075_v0  ;;  %s933_s23 = sshll.u32 %s1302_s18, 2  ;;  %v1078_v3 = vld [vmem:[%s1294_s1 + $0x20] sm:$0xff]   ;;  %v1079_v6 = vld [vmem:[%s1294_s1 + $0x18] sm:$0xff]   ;;  %v1080_v7 = vld [vmem:[%s1294_s1 + $0x10] sm:$0xff]   ;;  %s935_s12 = sshll.u32 %s1302_s18, 3 }
   0xe   : > { %988 = vmatpush3.bf16.msra.mxu0 %v1075_v0  ;;  %1043 = vmatpush3.bf16.msra.mxu1 %v1075_v0  ;;  %s1176_s26 = scalar_lea.vmem %s1293_s0, %s933_s23  ;;  %v1081_v8 = vld [vmem:[%s1294_s1 + $0x8] sm:$0xff]   ;;  %v1082_v9 = vld [vmem:[%s1294_s1] sm:$0xff]   ;;  %s1220_s19 = scalar_lea.vmem %s1296_s3, %s935_s12 }
   0xf   : > { %989 = vmatprep.subr.bf16.mxu0 %v1076_v1  ;;  %1036 = vmatprep.subr.bf16.mxu1 %v1076_v1  ;;  %v1083_v4 = vld [vmem:[%s1176_s26] sm:$0xff]   ;;  %v1085_v10 = vld [vmem:[%s1176_s26 + $0x8] sm:$0xff]   ;;  %v1087_v12 = vld [vmem:[%s1176_s26 + $0x10] sm:$0xff]  }
  0x10   : > { %v1084_v5 = vld [vmem:[%s1176_s26 + $0x40] sm:$0xff]   ;;  %1003 = vmatprep.mubr.bf16.mxu0 %v1083_v4  ;;  %v1086_v11 = vld [vmem:[%s1176_s26 + $0x48] sm:$0xff]   ;;  %v1088_v13 = vld [vmem:[%s1176_s26 + $0x50] sm:$0xff]  }
  0x11   : > { %1019 = vmatprep.mubr.bf16.mxu1 %v1084_v5  ;;  %v1089_v14 = vld [vmem:[%s1176_s26 + $0x18] sm:$0xff]   ;;  %v1091_v16 = vld [vmem:[%s1176_s26 + $0x20] sm:$0xff]   ;;  %v1093_v18 = vld [vmem:[%s1176_s26 + $0x28] sm:$0xff]  }
  0x12   : > { %990 = vmatpush3.bf16.msra.mxu0 %v1076_v1  ;;  %1044 = vmatpush3.bf16.msra.mxu1 %v1076_v1  ;;  %v1090_v15 = vld [vmem:[%s1176_s26 + $0x58] sm:$0xff]   ;;  %v1092_v17 = vld [vmem:[%s1176_s26 + $0x60] sm:$0xff]   ;;  %v1094_v19 = vld [vmem:[%s1176_s26 + $0x68] sm:$0xff]  }
  0x13   : > { %991 = vmatprep.subr.bf16.mxu0 %v1077_v2  ;;  %1037 = vmatprep.subr.bf16.mxu1 %v1077_v2  ;;  %v1095_v20 = vld [vmem:[%s1176_s26 + $0x30] sm:$0xff]   ;;  %v1097_v22 = vld [vmem:[%s1176_s26 + $0x38] sm:$0xff]   ;;  %v1212_v24 = vld [vmem:[%s1295_s2] ss:$0 sm:$0xff] }
  0x14   : > { %v1096_v21 = vld [vmem:[%s1176_s26 + $0x70] sm:$0xff]   ;;  %v1098_v23 = vld [vmem:[%s1176_s26 + $0x78] sm:$0xff]  }
  0x16   : > { %992 = vmatpush3.bf16.msra.mxu0 %v1077_v2  ;;  %1045 = vmatpush3.bf16.msra.mxu1 %v1077_v2 }
  0x17   : > { %993 = vmatprep.subr.bf16.mxu0 %v1078_v3  ;;  %1038 = vmatprep.subr.bf16.mxu1 %v1078_v3 }
  0x1a   : > { %994 = vmatpush3.bf16.msra.mxu0 %v1078_v3  ;;  %1046 = vmatpush3.bf16.msra.mxu1 %v1078_v3 }
  0x1b   : > { %995 = vmatprep.subr.bf16.mxu0 %v1079_v6  ;;  %1039 = vmatprep.subr.bf16.mxu1 %v1079_v6 }
  0x1e   : > { %996 = vmatpush3.bf16.msra.mxu0 %v1079_v6  ;;  %1047 = vmatpush3.bf16.msra.mxu1 %v1079_v6 }
  0x1f   : > { %997 = vmatprep.subr.bf16.mxu0 %v1080_v7  ;;  %1040 = vmatprep.subr.bf16.mxu1 %v1080_v7 }
  0x22   : > { %998 = vmatpush3.bf16.msra.mxu0 %v1080_v7  ;;  %1048 = vmatpush3.bf16.msra.mxu1 %v1080_v7 }
  0x23   : > { %999 = vmatprep.subr.bf16.mxu0 %v1081_v8  ;;  %1041 = vmatprep.subr.bf16.mxu1 %v1081_v8 }
  0x26   : > { %1000 = vmatpush3.bf16.msra.mxu0 %v1081_v8  ;;  %1049 = vmatpush3.bf16.msra.mxu1 %v1081_v8 }
  0x27   : > { %1001 = vmatprep.subr.bf16.mxu0 %v1082_v9  ;;  %1042 = vmatprep.subr.bf16.mxu1 %v1082_v9 }
  0x2a   : > { %1002 = vmatpush3.bf16.msra.mxu0 %v1082_v9  ;;  %1050 = vmatpush3.bf16.msra.mxu1 %v1082_v9 }
  0x2d   : > { %1004 = vmatmul.mubr.bf16.vlgmr.msra.gmra.mxu0 %v1085_v10  ;;  %1020 = vmatmul.mubr.bf16.vlgmr.msra.gmra.mxu1 %v1086_v11 }
  0x2e   : > { %1007 = vmatprep.mubr.bf16.mxu0 %v1087_v12  ;;  %1023 = vmatprep.mubr.bf16.mxu1 %v1088_v13 }
  0x35   : > { %1008 = vmatmul.mubr.bf16.gmra.mxu0 %v1089_v14  ;;  %1024 = vmatmul.mubr.bf16.gmra.mxu1 %v1090_v15 }
  0x36   : > { %1011 = vmatprep.mubr.bf16.mxu0 %v1091_v16  ;;  %1027 = vmatprep.mubr.bf16.mxu1 %v1092_v17 }
  0x3d   : > { %1012 = vmatmul.mubr.bf16.gmra.mxu0 %v1093_v18  ;;  %1028 = vmatmul.mubr.bf16.gmra.mxu1 %v1094_v19 }
  0x3e   : > { %1015 = vmatprep.mubr.bf16.mxu0 %v1095_v20  ;;  %1031 = vmatprep.mubr.bf16.mxu1 %v1096_v21 }
  0x45   : > { %1016 = vmatmul.mubr.bf16.gmra.mxu0 %v1097_v22  ;;  %1032 = vmatmul.mubr.bf16.gmra.mxu1 %v1098_v23 }
  0xed   : > { %v1005_v25 = vpop.f32.mrf.mxu0  ;;  %v1021_v26 = vpop.f32.mrf.mxu1 }
  0xee   : > { %v749_v27 = vadd.f32 %v1005_v25, %v1212_v24  ;;  %v765_v28 = vadd.f32 %v1021_v26, %v1212_v24 }
  0xef   : > { %v514_v29 = vpop.f32.mrf.mxu0  ;;  %v578_v30 = vpop.f32.mrf.mxu1 }
  0xf0   : > { %v781_v31 = vmax.f32 %v749_v27, 0.0  ;;  %v797_v32 = vmax.f32 %v765_v28, 0.0  ;;  %v747_v33 = vadd.f32 %v1212_v24, %v514_v29  ;;  %v763_v34 = vadd.f32 %v1212_v24, %v578_v30 }
  0xf1   : > { %v1006_v35 = vpop.f32.mrf.mxu0  ;;  %v1022_v36 = vpop.f32.mrf.mxu1 }
  0xf2   : > { %813 = vst [vmem:[%s1220_s19 + $0x10] sm:$0xff] %v781_v31  ;;  %829 = vst [vmem:[%s1220_s19 + $0x90] sm:$0xff] %v797_v32  ;;  %v779_v37 = vmax.f32 %v747_v33, 0.0  ;;  %v795_v38 = vmax.f32 %v763_v34, 0.0  ;;  %v750_v39 = vadd.f32 %v1006_v35, %v1212_v24  ;;  %v766_v40 = vadd.f32 %v1022_v36, %v1212_v24 }
  0xf3   : > { %v517_v41 = vpop.f32.mrf.mxu0  ;;  %v581_v42 = vpop.f32.mrf.mxu1 }
  0xf4   : > { %811 = vst [vmem:[%s1220_s19] sm:$0xff] %v779_v37  ;;  %827 = vst [vmem:[%s1220_s19 + $0x80] sm:$0xff] %v795_v38  ;;  %v782_v43 = vmax.f32 %v750_v39, 0.0  ;;  %v798_v44 = vmax.f32 %v766_v40, 0.0  ;;  %v748_v45 = vadd.f32 %v1212_v24, %v517_v41  ;;  %v764_v46 = vadd.f32 %v1212_v24, %v581_v42 }
  0xf5   : > { %v1009_v47 = vpop.f32.mrf.mxu0  ;;  %v1025_v48 = vpop.f32.mrf.mxu1 }
  0xf6   : > { %814 = vst [vmem:[%s1220_s19 + $0x18] sm:$0xff] %v782_v43  ;;  %830 = vst [vmem:[%s1220_s19 + $0x98] sm:$0xff] %v798_v44  ;;  %v780_v49 = vmax.f32 %v748_v45, 0.0  ;;  %v796_v50 = vmax.f32 %v764_v46, 0.0  ;;  %v753_v51 = vadd.f32 %v1009_v47, %v1212_v24  ;;  %v769_v52 = vadd.f32 %v1025_v48, %v1212_v24 }
  0xf7   : > { %v530_v53 = vpop.f32.mrf.mxu0  ;;  %v594_v54 = vpop.f32.mrf.mxu1 }
  0xf8   : > { %812 = vst [vmem:[%s1220_s19 + $0x8] sm:$0xff] %v780_v49  ;;  %828 = vst [vmem:[%s1220_s19 + $0x88] sm:$0xff] %v796_v50  ;;  %v785_v55 = vmax.f32 %v753_v51, 0.0  ;;  %v801_v56 = vmax.f32 %v769_v52, 0.0  ;;  %v751_v57 = vadd.f32 %v1212_v24, %v530_v53  ;;  %v767_v58 = vadd.f32 %v1212_v24, %v594_v54 }
  0xf9   : > { %v1010_v59 = vpop.f32.mrf.mxu0  ;;  %v1026_v60 = vpop.f32.mrf.mxu1 }
  0xfa   : > { %817 = vst [vmem:[%s1220_s19 + $0x30] sm:$0xff] %v785_v55  ;;  %833 = vst [vmem:[%s1220_s19 + $0xb0] sm:$0xff] %v801_v56  ;;  %v783_v61 = vmax.f32 %v751_v57, 0.0  ;;  %v799_v62 = vmax.f32 %v767_v58, 0.0  ;;  %v754_v63 = vadd.f32 %v1010_v59, %v1212_v24  ;;  %v770_v0 = vadd.f32 %v1026_v60, %v1212_v24 }
  0xfb   : > { %v533_v1 = vpop.f32.mrf.mxu0  ;;  %v597_v2 = vpop.f32.mrf.mxu1 }
  0xfc   : > { %815 = vst [vmem:[%s1220_s19 + $0x20] sm:$0xff] %v783_v61  ;;  %831 = vst [vmem:[%s1220_s19 + $0xa0] sm:$0xff] %v799_v62  ;;  %v786_v3 = vmax.f32 %v754_v63, 0.0  ;;  %v802_v4 = vmax.f32 %v770_v0, 0.0  ;;  %v752_v5 = vadd.f32 %v1212_v24, %v533_v1  ;;  %v768_v6 = vadd.f32 %v1212_v24, %v597_v2 }
  0xfd   : > { %v1013_v7 = vpop.f32.mrf.mxu0  ;;  %v1029_v8 = vpop.f32.mrf.mxu1 }
  0xfe   : > { %818 = vst [vmem:[%s1220_s19 + $0x38] sm:$0xff] %v786_v3  ;;  %834 = vst [vmem:[%s1220_s19 + $0xb8] sm:$0xff] %v802_v4  ;;  %v784_v9 = vmax.f32 %v752_v5, 0.0  ;;  %v800_v10 = vmax.f32 %v768_v6, 0.0  ;;  %v757_v11 = vadd.f32 %v1013_v7, %v1212_v24  ;;  %v773_v12 = vadd.f32 %v1029_v8, %v1212_v24 }
  0xff   : > { %v546_v13 = vpop.f32.mrf.mxu0  ;;  %v610_v14 = vpop.f32.mrf.mxu1 }
 0x100   : > { %816 = vst [vmem:[%s1220_s19 + $0x28] sm:$0xff] %v784_v9  ;;  %832 = vst [vmem:[%s1220_s19 + $0xa8] sm:$0xff] %v800_v10  ;;  %v789_v15 = vmax.f32 %v757_v11, 0.0  ;;  %v805_v16 = vmax.f32 %v773_v12, 0.0  ;;  %v755_v17 = vadd.f32 %v1212_v24, %v546_v13  ;;  %v771_v18 = vadd.f32 %v1212_v24, %v610_v14 }
 0x101   : > { %v1014_v19 = vpop.f32.mrf.mxu0  ;;  %v1030_v20 = vpop.f32.mrf.mxu1 }
 0x102   : > { %821 = vst [vmem:[%s1220_s19 + $0x50] sm:$0xff] %v789_v15  ;;  %837 = vst [vmem:[%s1220_s19 + $0xd0] sm:$0xff] %v805_v16  ;;  %v787_v21 = vmax.f32 %v755_v17, 0.0  ;;  %v803_v22 = vmax.f32 %v771_v18, 0.0  ;;  %v758_v23 = vadd.f32 %v1014_v19, %v1212_v24  ;;  %v774_v25 = vadd.f32 %v1030_v20, %v1212_v24 }
 0x103   : > { %v549_v26 = vpop.f32.mrf.mxu0  ;;  %v613_v27 = vpop.f32.mrf.mxu1 }
 0x104   : > { %819 = vst [vmem:[%s1220_s19 + $0x40] sm:$0xff] %v787_v21  ;;  %835 = vst [vmem:[%s1220_s19 + $0xc0] sm:$0xff] %v803_v22  ;;  %v790_v28 = vmax.f32 %v758_v23, 0.0  ;;  %v806_v29 = vmax.f32 %v774_v25, 0.0  ;;  %v756_v30 = vadd.f32 %v1212_v24, %v549_v26  ;;  %v772_v31 = vadd.f32 %v1212_v24, %v613_v27 }
 0x105   : > { %v1017_v32 = vpop.f32.mrf.mxu0  ;;  %v1033_v33 = vpop.f32.mrf.mxu1 }
 0x106   : > { %822 = vst [vmem:[%s1220_s19 + $0x58] sm:$0xff] %v790_v28  ;;  %838 = vst [vmem:[%s1220_s19 + $0xd8] sm:$0xff] %v806_v29  ;;  %v788_v34 = vmax.f32 %v756_v30, 0.0  ;;  %v804_v35 = vmax.f32 %v772_v31, 0.0  ;;  %v761_v36 = vadd.f32 %v1017_v32, %v1212_v24  ;;  %v777_v37 = vadd.f32 %v1033_v33, %v1212_v24 }
 0x107   : > { %v562_v38 = vpop.f32.mrf.mxu0  ;;  %v626_v39 = vpop.f32.mrf.mxu1 }
 0x108   : > { %820 = vst [vmem:[%s1220_s19 + $0x48] sm:$0xff] %v788_v34  ;;  %836 = vst [vmem:[%s1220_s19 + $0xc8] sm:$0xff] %v804_v35  ;;  %v793_v40 = vmax.f32 %v761_v36, 0.0  ;;  %v809_v41 = vmax.f32 %v777_v37, 0.0  ;;  %v759_v42 = vadd.f32 %v1212_v24, %v562_v38  ;;  %v775_v43 = vadd.f32 %v1212_v24, %v626_v39 }
 0x109   : > { %v1018_v44 = vpop.f32.mrf.mxu0  ;;  %v1034_v45 = vpop.f32.mrf.mxu1 }
 0x10a   : > { %825 = vst [vmem:[%s1220_s19 + $0x70] sm:$0xff] %v793_v40  ;;  %841 = vst [vmem:[%s1220_s19 + $0xf0] sm:$0xff] %v809_v41  ;;  %v791_v46 = vmax.f32 %v759_v42, 0.0  ;;  %v807_v47 = vmax.f32 %v775_v43, 0.0  ;;  %v762_v48 = vadd.f32 %v1018_v44, %v1212_v24  ;;  %v778_v49 = vadd.f32 %v1034_v45, %v1212_v24 }
 0x10b   : > { %v565_v50 = vpop.f32.mrf.mxu0  ;;  %v629_v51 = vpop.f32.mrf.mxu1 }
 0x10c   : > { %823 = vst [vmem:[%s1220_s19 + $0x60] sm:$0xff] %v791_v46  ;;  %839 = vst [vmem:[%s1220_s19 + $0xe0] sm:$0xff] %v807_v47  ;;  %v794_v52 = vmax.f32 %v762_v48, 0.0  ;;  %v810_v53 = vmax.f32 %v778_v49, 0.0  ;;  %v760_v54 = vadd.f32 %v1212_v24, %v565_v50  ;;  %v776_v55 = vadd.f32 %v1212_v24, %v629_v51 }
 0x10e   : > { %826 = vst [vmem:[%s1220_s19 + $0x78] sm:$0xff] %v794_v52  ;;  %842 = vst [vmem:[%s1220_s19 + $0xf8] sm:$0xff] %v810_v53  ;;  %v792_v56 = vmax.f32 %v760_v54, 0.0  ;;  %v808_v57 = vmax.f32 %v776_v55, 0.0 }
 0x110   : > { %824 = vst [vmem:[%s1220_s19 + $0x68] sm:$0xff] %v792_v56  ;;  %840 = vst [vmem:[%s1220_s19 + $0xe8] sm:$0xff] %v808_v57 }
 0x111 PF: > { %s13_s14 = sadd.s32 1, %s1121_s14   ;;  %s1297_s12 = smov %s1117_s13 }
 0x112   : > { %p10_p5 = scmp.ge.s32.totalorder %s13_s14, 4   ;;  %s1298_s13 = smov %s1300_s15 }
 0x114   :  { %12 = sbr.rel (!%p10_p5) target bundleno = 2 (0x2), region = 73 }

// kernel: pallas_hourglass.17
= control target key start
LH: loop header
LB: loop body
LE: loop exit
PB: predicated region body
PF: predicated region fallthrough
CT: control target
= control target key end

     0   :  { %s1275_s15 = smov 0   ;;  %s1277_s16 = smov 0   ;;  %s1462_s0 = inlined_call_operand.vmem [shape: bf16[512,128], index: 0, kind: input, shape index: {}]   ;;  %s1463_s1 = inlined_call_operand.vmem [shape: bf16[128,128], index: 1, kind: input, shape index: {}]   ;;  %s1464_s2 = inlined_call_operand.vmem [shape: f32[1,128], index: 2, kind: input, shape index: {}]   ;;  %s1465_s3 = inlined_call_operand.vmem [shape: f32[512,128], index: 3, kind: input, shape index: {}]   ;;  %s1466_s4 = inlined_call_operand.vmem [shape: f32[512,128], index: 4, kind: output, shape index: {}]  }
   0x1   :  { %s1279_s17 = smov 0  }
   0x2 LB: > { %s26_s18 = sadd.s32 1, %s1244_s16  ;;  %p1056_p0 = scmp.ge.s32.totalorder %s1248_s17, 1  ;;  %s1248_s17 = sphi %s1279_s17, %s14_s17   ;;  %s1244_s16 = sphi %s1277_s16, %s1468_s16   ;;  %s1240_s15 = sphi %s1275_s15, %s1467_s15  }
   0x3   : > { %p28_p1 = scmp.ge.s32.totalorder %s26_s18, 2  ;;  %p202_p2 = scmp.lt.s32.totalorder %s1248_s17, 3 }
   0x5   : > { %s1470_s18 = smov (%p28_p1, %s26_s18), 0  ;;  %p203_p3 = pnand %p1056_p0, %p202_p2 }
   0x6   : > { %s1057_s21 = sshll.u32 (!%p203_p3), %s1240_s15, 5 }
   0x7   : > { %206 = sbr.rel (%p203_p3) target bundleno = 275 (0x113), region = 36  ;;  %p242_p4 = scmp.lt.s32.totalorder (!%p203_p3), %s1057_s21, 63 }
   0xc   : > { %v1202_v0 = vld [vmem:[%s1463_s1 + $0x38] sm:$0xff]   ;;  %v1203_v1 = vld [vmem:[%s1463_s1 + $0x30] sm:$0xff]   ;;  %s1472_s21 = smov (!%p242_p4, %s1057_s21), 63  ;;  %v1204_v2 = vld [vmem:[%s1463_s1 + $0x28] sm:$0xff]  }
   0xd   : > { %1114 = vmatprep.subr.bf16.mxu0 %v1202_v0  ;;  %1162 = vmatprep.subr.bf16.mxu1 %v1202_v0  ;;  %s1058_s26 = sshll.u32 %s1472_s21, 2  ;;  %v1205_v3 = vld [vmem:[%s1463_s1 + $0x20] sm:$0xff]   ;;  %v1206_v6 = vld [vmem:[%s1463_s1 + $0x18] sm:$0xff]   ;;  %v1207_v7 = vld [vmem:[%s1463_s1 + $0x10] sm:$0xff]   ;;  %s1060_s14 = sshll.u32 %s1472_s21, 3 }
   0xe   : > { %1115 = vmatpush3.bf16.msra.mxu0 %v1202_v0  ;;  %1170 = vmatpush3.bf16.msra.mxu1 %v1202_v0  ;;  %s1308_s29 = scalar_lea.vmem %s1462_s0, %s1058_s26  ;;  %v1208_v8 = vld [vmem:[%s1463_s1 + $0x8] sm:$0xff]   ;;  %v1209_v9 = vld [vmem:[%s1463_s1] sm:$0xff]   ;;  %s1345_s20 = scalar_lea.vmem %s1465_s3, %s1060_s14 }
   0xf   : > { %1116 = vmatprep.subr.bf16.mxu0 %v1203_v1  ;;  %1163 = vmatprep.subr.bf16.mxu1 %v1203_v1  ;;  %v1210_v4 = vld [vmem:[%s1308_s29] sm:$0xff]   ;;  %v1212_v10 = vld [vmem:[%s1308_s29 + $0x8] sm:$0xff]   ;;  %v1214_v12 = vld [vmem:[%s1308_s29 + $0x10] sm:$0xff]   ;;  %s1363_s25 = scalar_lea.vmem %s1466_s4, %s1060_s14 }
  0x10   : > { %v1211_v5 = vld [vmem:[%s1308_s29 + $0x40] sm:$0xff]   ;;  %1130 = vmatprep.mubr.bf16.mxu0 %v1210_v4  ;;  %v1213_v11 = vld [vmem:[%s1308_s29 + $0x48] sm:$0xff]   ;;  %v1215_v13 = vld [vmem:[%s1308_s29 + $0x50] sm:$0xff]  }
  0x11   : > { %1146 = vmatprep.mubr.bf16.mxu1 %v1211_v5  ;;  %v1216_v14 = vld [vmem:[%s1308_s29 + $0x18] sm:$0xff]   ;;  %v1218_v16 = vld [vmem:[%s1308_s29 + $0x20] sm:$0xff]   ;;  %v1220_v18 = vld [vmem:[%s1308_s29 + $0x28] sm:$0xff]  }
  0x12   : > { %1117 = vmatpush3.bf16.msra.mxu0 %v1203_v1  ;;  %1171 = vmatpush3.bf16.msra.mxu1 %v1203_v1  ;;  %v1217_v15 = vld [vmem:[%s1308_s29 + $0x58] sm:$0xff]   ;;  %v1219_v17 = vld [vmem:[%s1308_s29 + $0x60] sm:$0xff]   ;;  %v1221_v19 = vld [vmem:[%s1308_s29 + $0x68] sm:$0xff]  }
  0x13   : > { %1118 = vmatprep.subr.bf16.mxu0 %v1204_v2  ;;  %1164 = vmatprep.subr.bf16.mxu1 %v1204_v2  ;;  %v1222_v20 = vld [vmem:[%s1308_s29 + $0x30] sm:$0xff]   ;;  %v1224_v22 = vld [vmem:[%s1308_s29 + $0x38] sm:$0xff]   ;;  %v1350_v24 = vld [vmem:[%s1464_s2] ss:$0 sm:$0xff] }
  0x14   : > { %v1223_v21 = vld [vmem:[%s1308_s29 + $0x70] sm:$0xff]   ;;  %v1225_v23 = vld [vmem:[%s1308_s29 + $0x78] sm:$0xff]   ;;  %v828_v32 = vld [vmem:[%s1345_s20] sm:$0xff] }
  0x15   : > { %v830_v26 = vld [vmem:[%s1345_s20 + $0x10] sm:$0xff]  ;;  %v844_v34 = vld [vmem:[%s1345_s20 + $0x80] sm:$0xff]  ;;  %v831_v45 = vld [vmem:[%s1345_s20 + $0x18] sm:$0xff] }
  0x16   : > { %1119 = vmatpush3.bf16.msra.mxu0 %v1204_v2  ;;  %1172 = vmatpush3.bf16.msra.mxu1 %v1204_v2  ;;  %v846_v28 = vld [vmem:[%s1345_s20 + $0x90] sm:$0xff]  ;;  %v847_v46 = vld [vmem:[%s1345_s20 + $0x98] sm:$0xff]  ;;  %v829_v50 = vld [vmem:[%s1345_s20 + $0x8] sm:$0xff] }
  0x17   : > { %1120 = vmatprep.subr.bf16.mxu0 %v1205_v3  ;;  %1165 = vmatprep.subr.bf16.mxu1 %v1205_v3  ;;  %v845_v52 = vld [vmem:[%s1345_s20 + $0x88] sm:$0xff]  ;;  %v834_v60 = vld [vmem:[%s1345_s20 + $0x30] sm:$0xff] }
  0x18   : > { %v850_v62 = vld [vmem:[%s1345_s20 + $0xb0] sm:$0xff] }
  0x1a   : > { %1121 = vmatpush3.bf16.msra.mxu0 %v1205_v3  ;;  %1173 = vmatpush3.bf16.msra.mxu1 %v1205_v3 }
  0x1b   : > { %1122 = vmatprep.subr.bf16.mxu0 %v1206_v6  ;;  %1166 = vmatprep.subr.bf16.mxu1 %v1206_v6 }
  0x1e   : > { %1123 = vmatpush3.bf16.msra.mxu0 %v1206_v6  ;;  %1174 = vmatpush3.bf16.msra.mxu1 %v1206_v6 }
  0x1f   : > { %1124 = vmatprep.subr.bf16.mxu0 %v1207_v7  ;;  %1167 = vmatprep.subr.bf16.mxu1 %v1207_v7 }
  0x22   : > { %1125 = vmatpush3.bf16.msra.mxu0 %v1207_v7  ;;  %1175 = vmatpush3.bf16.msra.mxu1 %v1207_v7 }
  0x23   : > { %1126 = vmatprep.subr.bf16.mxu0 %v1208_v8  ;;  %1168 = vmatprep.subr.bf16.mxu1 %v1208_v8 }
  0x26   : > { %1127 = vmatpush3.bf16.msra.mxu0 %v1208_v8  ;;  %1176 = vmatpush3.bf16.msra.mxu1 %v1208_v8 }
  0x27   : > { %1128 = vmatprep.subr.bf16.mxu0 %v1209_v9  ;;  %1169 = vmatprep.subr.bf16.mxu1 %v1209_v9 }
  0x2a   : > { %1129 = vmatpush3.bf16.msra.mxu0 %v1209_v9  ;;  %1177 = vmatpush3.bf16.msra.mxu1 %v1209_v9 }
  0x2d   : > { %1131 = vmatmul.mubr.bf16.vlgmr.msra.gmra.mxu0 %v1212_v10  ;;  %1147 = vmatmul.mubr.bf16.vlgmr.msra.gmra.mxu1 %v1213_v11  ;;  %v832_v11 = vld [vmem:[%s1345_s20 + $0x20] sm:$0xff] }
  0x2e   : > { %1134 = vmatprep.mubr.bf16.mxu0 %v1214_v12  ;;  %1150 = vmatprep.mubr.bf16.mxu1 %v1215_v13  ;;  %v848_v12 = vld [vmem:[%s1345_s20 + $0xa0] sm:$0xff] }
  0x35   : > { %1135 = vmatmul.mubr.bf16.gmra.mxu0 %v1216_v14  ;;  %1151 = vmatmul.mubr.bf16.gmra.mxu1 %v1217_v15 }
  0x36   : > { %1138 = vmatprep.mubr.bf16.mxu0 %v1218_v16  ;;  %1154 = vmatprep.mubr.bf16.mxu1 %v1219_v17  ;;  %v835_v16 = vld [vmem:[%s1345_s20 + $0x38] sm:$0xff] }
  0x3d   : > { %1139 = vmatmul.mubr.bf16.gmra.mxu0 %v1220_v18  ;;  %1155 = vmatmul.mubr.bf16.gmra.mxu1 %v1221_v19  ;;  %v851_v18 = vld [vmem:[%s1345_s20 + $0xb8] sm:$0xff] }
  0x3e   : > { %1142 = vmatprep.mubr.bf16.mxu0 %v1222_v20  ;;  %1158 = vmatprep.mubr.bf16.mxu1 %v1223_v21 }
  0x45   : > { %1143 = vmatmul.mubr.bf16.gmra.mxu0 %v1224_v22  ;;  %1159 = vmatmul.mubr.bf16.gmra.mxu1 %v1225_v23 }
  0xed   : > { %v1132_v25 = vpop.f32.mrf.mxu0  ;;  %v1148_v27 = vpop.f32.mrf.mxu1 }
  0xee   : > { %v798_v29 = vadd.f32 %v1132_v25, %v1350_v24  ;;  %v814_v30 = vadd.f32 %v1148_v27, %v1350_v24  ;;  %v833_v27 = vld [vmem:[%s1345_s20 + $0x28] sm:$0xff] }
  0xef   : > { %v563_v31 = vpop.f32.mrf.mxu0  ;;  %v627_v33 = vpop.f32.mrf.mxu1 }
  0xf0   : > { %v862_v35 = vadd.f32 %v830_v26, %v798_v29  ;;  %v878_v36 = vadd.f32 %v846_v28, %v814_v30  ;;  %v796_v37 = vadd.f32 %v1350_v24, %v563_v31  ;;  %v812_v38 = vadd.f32 %v1350_v24, %v627_v33  ;;  %v849_v29 = vld [vmem:[%s1345_s20 + $0xa8] sm:$0xff] }
  0xf1   : > { %v1133_v39 = vpop.f32.mrf.mxu0  ;;  %v1149_v40 = vpop.f32.mrf.mxu1 }
  0xf2   : > { %v894_v41 = vmax.f32 %v862_v35, 0.0  ;;  %v910_v42 = vmax.f32 %v878_v36, 0.0  ;;  %v860_v43 = vadd.f32 %v828_v32, %v796_v37  ;;  %v876_v44 = vadd.f32 %v844_v34, %v812_v38 }
  0xf3   : > { %v799_v47 = vadd.f32 %v1133_v39, %v1350_v24  ;;  %v815_v48 = vadd.f32 %v1149_v40, %v1350_v24  ;;  %v566_v49 = vpop.f32.mrf.mxu0  ;;  %v630_v51 = vpop.f32.mrf.mxu1 }
  0xf4   : > { %926 = vst [vmem:[%s1363_s25 + $0x10] sm:$0xff] %v894_v41  ;;  %942 = vst [vmem:[%s1363_s25 + $0x90] sm:$0xff] %v910_v42  ;;  %v892_v53 = vmax.f32 %v860_v43, 0.0  ;;  %v908_v54 = vmax.f32 %v876_v44, 0.0  ;;  %v797_v55 = vadd.f32 %v1350_v24, %v566_v49  ;;  %v813_v56 = vadd.f32 %v1350_v24, %v630_v51  ;;  %v838_v42 = vld [vmem:[%s1345_s20 + $0x50] sm:$0xff]  ;;  %v852_v49 = vld [vmem:[%s1345_s20 + $0xc0] sm:$0xff] }
  0xf5   : > { %v863_v57 = vadd.f32 %v831_v45, %v799_v47  ;;  %v879_v58 = vadd.f32 %v847_v46, %v815_v48  ;;  %v1136_v59 = vpop.f32.mrf.mxu0  ;;  %v1152_v61 = vpop.f32.mrf.mxu1  ;;  %v854_v43 = vld [vmem:[%s1345_s20 + $0xd0] sm:$0xff]  ;;  %v836_v47 = vld [vmem:[%s1345_s20 + $0x40] sm:$0xff] }
  0xf6   : > { %924 = vst [vmem:[%s1363_s25] sm:$0xff] %v892_v53  ;;  %940 = vst [vmem:[%s1363_s25 + $0x80] sm:$0xff] %v908_v54  ;;  %v861_v63 = vadd.f32 %v829_v50, %v797_v55  ;;  %v877_v0 = vadd.f32 %v845_v52, %v813_v56  ;;  %v802_v1 = vadd.f32 %v1136_v59, %v1350_v24  ;;  %v855_v59 = vld [vmem:[%s1345_s20 + $0xd8] sm:$0xff] }
  0xf7   : > { %v818_v2 = vadd.f32 %v1152_v61, %v1350_v24  ;;  %v895_v3 = vmax.f32 %v863_v57, 0.0  ;;  %v911_v4 = vmax.f32 %v879_v58, 0.0  ;;  %v579_v5 = vpop.f32.mrf.mxu0  ;;  %v643_v6 = vpop.f32.mrf.mxu1  ;;  %v839_v57 = vld [vmem:[%s1345_s20 + $0x58] sm:$0xff] }
  0xf8   : > { %v893_v7 = vmax.f32 %v861_v63, 0.0  ;;  %v909_v8 = vmax.f32 %v877_v0, 0.0  ;;  %v866_v9 = vadd.f32 %v834_v60, %v802_v1  ;;  %v800_v13 = vadd.f32 %v1350_v24, %v579_v5 }
  0xf9   : > { %v882_v10 = vadd.f32 %v850_v62, %v818_v2  ;;  %927 = vst [vmem:[%s1363_s25 + $0x18] sm:$0xff] %v895_v3  ;;  %943 = vst [vmem:[%s1363_s25 + $0x98] sm:$0xff] %v911_v4  ;;  %v816_v14 = vadd.f32 %v1350_v24, %v643_v6  ;;  %v1137_v15 = vpop.f32.mrf.mxu0  ;;  %v1153_v17 = vpop.f32.mrf.mxu1 }
  0xfa   : > { %925 = vst [vmem:[%s1363_s25 + $0x8] sm:$0xff] %v893_v7  ;;  %941 = vst [vmem:[%s1363_s25 + $0x88] sm:$0xff] %v909_v8  ;;  %v898_v19 = vmax.f32 %v866_v9, 0.0  ;;  %v803_v21 = vadd.f32 %v1137_v15, %v1350_v24  ;;  %v819_v22 = vadd.f32 %v1153_v17, %v1350_v24  ;;  %v864_v23 = vadd.f32 %v832_v11, %v800_v13  ;;  %v837_v8 = vld [vmem:[%s1345_s20 + $0x48] sm:$0xff]  ;;  %v842_v13 = vld [vmem:[%s1345_s20 + $0x70] sm:$0xff] }
  0xfb   : > { %v914_v20 = vmax.f32 %v882_v10, 0.0  ;;  %v880_v25 = vadd.f32 %v848_v12, %v816_v14  ;;  %v582_v26 = vpop.f32.mrf.mxu0  ;;  %v646_v28 = vpop.f32.mrf.mxu1  ;;  %v853_v9 = vld [vmem:[%s1345_s20 + $0xc8] sm:$0xff]  ;;  %v858_v15 = vld [vmem:[%s1345_s20 + $0xf0] sm:$0xff] }
  0xfc   : > { %930 = vst [vmem:[%s1363_s25 + $0x30] sm:$0xff] %v898_v19  ;;  %v867_v30 = vadd.f32 %v835_v16, %v803_v21  ;;  %v883_v31 = vadd.f32 %v851_v18, %v819_v22  ;;  %v801_v32 = vadd.f32 %v1350_v24, %v582_v26  ;;  %v817_v33 = vadd.f32 %v1350_v24, %v646_v28  ;;  %v856_v26 = vld [vmem:[%s1345_s20 + $0xe0] sm:$0xff] }
  0xfd   : > { %946 = vst [vmem:[%s1363_s25 + $0xb0] sm:$0xff] %v914_v20  ;;  %v896_v34 = vmax.f32 %v864_v23, 0.0  ;;  %v912_v35 = vmax.f32 %v880_v25, 0.0  ;;  %v1140_v36 = vpop.f32.mrf.mxu0  ;;  %v1156_v37 = vpop.f32.mrf.mxu1  ;;  %v840_v23 = vld [vmem:[%s1345_s20 + $0x60] sm:$0xff] }
  0xfe   : > { %v899_v38 = vmax.f32 %v867_v30, 0.0  ;;  %v915_v39 = vmax.f32 %v883_v31, 0.0  ;;  %v865_v40 = vadd.f32 %v833_v27, %v801_v32  ;;  %v881_v41 = vadd.f32 %v849_v29, %v817_v33 }
  0xff   : > { %928 = vst [vmem:[%s1363_s25 + $0x20] sm:$0xff] %v896_v34  ;;  %944 = vst [vmem:[%s1363_s25 + $0xa0] sm:$0xff] %v912_v35  ;;  %v806_v44 = vadd.f32 %v1140_v36, %v1350_v24  ;;  %v822_v45 = vadd.f32 %v1156_v37, %v1350_v24  ;;  %v595_v46 = vpop.f32.mrf.mxu0  ;;  %v659_v48 = vpop.f32.mrf.mxu1 }
 0x100   : > { %931 = vst [vmem:[%s1363_s25 + $0x38] sm:$0xff] %v899_v38  ;;  %947 = vst [vmem:[%s1363_s25 + $0xb8] sm:$0xff] %v915_v39  ;;  %v897_v50 = vmax.f32 %v865_v40, 0.0  ;;  %v913_v51 = vmax.f32 %v881_v41, 0.0  ;;  %v804_v52 = vadd.f32 %v1350_v24, %v595_v46  ;;  %v820_v53 = vadd.f32 %v1350_v24, %v659_v48  ;;  %v843_v39 = vld [vmem:[%s1345_s20 + $0x78] sm:$0xff]  ;;  %v857_v46 = vld [vmem:[%s1345_s20 + $0xe8] sm:$0xff] }
 0x101   : > { %v870_v54 = vadd.f32 %v838_v42, %v806_v44  ;;  %v886_v55 = vadd.f32 %v854_v43, %v822_v45  ;;  %v1141_v56 = vpop.f32.mrf.mxu0  ;;  %v1157_v58 = vpop.f32.mrf.mxu1  ;;  %v859_v40 = vld [vmem:[%s1345_s20 + $0xf8] sm:$0xff]  ;;  %v841_v44 = vld [vmem:[%s1345_s20 + $0x68] sm:$0xff] }
 0x102   : > { %929 = vst [vmem:[%s1363_s25 + $0x28] sm:$0xff] %v897_v50  ;;  %945 = vst [vmem:[%s1363_s25 + $0xa8] sm:$0xff] %v913_v51  ;;  %v868_v60 = vadd.f32 %v836_v47, %v804_v52  ;;  %v884_v61 = vadd.f32 %v852_v49, %v820_v53  ;;  %v807_v62 = vadd.f32 %v1141_v56, %v1350_v24 }
 0x103   : > { %v823_v63 = vadd.f32 %v1157_v58, %v1350_v24  ;;  %v902_v0 = vmax.f32 %v870_v54, 0.0  ;;  %v918_v1 = vmax.f32 %v886_v55, 0.0  ;;  %v598_v2 = vpop.f32.mrf.mxu0  ;;  %v662_v3 = vpop.f32.mrf.mxu1 }
 0x104   : > { %v900_v4 = vmax.f32 %v868_v60, 0.0  ;;  %v916_v5 = vmax.f32 %v884_v61, 0.0  ;;  %v871_v6 = vadd.f32 %v839_v57, %v807_v62  ;;  %v805_v10 = vadd.f32 %v1350_v24, %v598_v2 }
 0x105   : > { %v887_v7 = vadd.f32 %v855_v59, %v823_v63  ;;  %934 = vst [vmem:[%s1363_s25 + $0x50] sm:$0xff] %v902_v0  ;;  %950 = vst [vmem:[%s1363_s25 + $0xd0] sm:$0xff] %v918_v1  ;;  %v821_v11 = vadd.f32 %v1350_v24, %v662_v3  ;;  %v1144_v12 = vpop.f32.mrf.mxu0  ;;  %v1160_v14 = vpop.f32.mrf.mxu1 }
 0x106   : > { %932 = vst [vmem:[%s1363_s25 + $0x40] sm:$0xff] %v900_v4  ;;  %948 = vst [vmem:[%s1363_s25 + $0xc0] sm:$0xff] %v916_v5  ;;  %v903_v16 = vmax.f32 %v871_v6, 0.0  ;;  %v810_v18 = vadd.f32 %v1144_v12, %v1350_v24  ;;  %v826_v19 = vadd.f32 %v1160_v14, %v1350_v24  ;;  %v869_v20 = vadd.f32 %v837_v8, %v805_v10 }
 0x107   : > { %v919_v17 = vmax.f32 %v887_v7, 0.0  ;;  %v885_v21 = vadd.f32 %v853_v9, %v821_v11  ;;  %v611_v22 = vpop.f32.mrf.mxu0  ;;  %v675_v25 = vpop.f32.mrf.mxu1 }
 0x108   : > { %935 = vst [vmem:[%s1363_s25 + $0x58] sm:$0xff] %v903_v16  ;;  %v874_v27 = vadd.f32 %v842_v13, %v810_v18  ;;  %v890_v28 = vadd.f32 %v858_v15, %v826_v19  ;;  %v808_v29 = vadd.f32 %v1350_v24, %v611_v22  ;;  %v824_v30 = vadd.f32 %v1350_v24, %v675_v25 }
 0x109   : > { %951 = vst [vmem:[%s1363_s25 + $0xd8] sm:$0xff] %v919_v17  ;;  %v901_v31 = vmax.f32 %v869_v20, 0.0  ;;  %v917_v32 = vmax.f32 %v885_v21, 0.0  ;;  %v1145_v33 = vpop.f32.mrf.mxu0  ;;  %v1161_v34 = vpop.f32.mrf.mxu1 }
 0x10a   : > { %v906_v35 = vmax.f32 %v874_v27, 0.0  ;;  %v922_v36 = vmax.f32 %v890_v28, 0.0  ;;  %v872_v37 = vadd.f32 %v840_v23, %v808_v29  ;;  %v888_v38 = vadd.f32 %v856_v26, %v824_v30 }
 0x10b   : > { %933 = vst [vmem:[%s1363_s25 + $0x48] sm:$0xff] %v901_v31  ;;  %949 = vst [vmem:[%s1363_s25 + $0xc8] sm:$0xff] %v917_v32  ;;  %v811_v41 = vadd.f32 %v1145_v33, %v1350_v24  ;;  %v827_v42 = vadd.f32 %v1161_v34, %v1350_v24  ;;  %v614_v43 = vpop.f32.mrf.mxu0  ;;  %v678_v45 = vpop.f32.mrf.mxu1 }
 0x10c   : > { %938 = vst [vmem:[%s1363_s25 + $0x70] sm:$0xff] %v906_v35  ;;  %954 = vst [vmem:[%s1363_s25 + $0xf0] sm:$0xff] %v922_v36  ;;  %v904_v47 = vmax.f32 %v872_v37, 0.0  ;;  %v920_v48 = vmax.f32 %v888_v38, 0.0  ;;  %v809_v49 = vadd.f32 %v1350_v24, %v614_v43  ;;  %v825_v50 = vadd.f32 %v1350_v24, %v678_v45 }
 0x10d   : > { %v875_v51 = vadd.f32 %v843_v39, %v811_v41  ;;  %v891_v52 = vadd.f32 %v859_v40, %v827_v42 }
 0x10e   : > { %936 = vst [vmem:[%s1363_s25 + $0x60] sm:$0xff] %v904_v47  ;;  %952 = vst [vmem:[%s1363_s25 + $0xe0] sm:$0xff] %v920_v48  ;;  %v873_v53 = vadd.f32 %v841_v44, %v809_v49  ;;  %v889_v54 = vadd.f32 %v857_v46, %v825_v50 }
 0x10f   : > { %v907_v55 = vmax.f32 %v875_v51, 0.0  ;;  %v923_v56 = vmax.f32 %v891_v52, 0.0 }
 0x110   : > { %v905_v57 = vmax.f32 %v873_v53, 0.0  ;;  %v921_v58 = vmax.f32 %v889_v54, 0.0 }
 0x111   : > { %939 = vst [vmem:[%s1363_s25 + $0x78] sm:$0xff] %v907_v55  ;;  %955 = vst [vmem:[%s1363_s25 + $0xf8] sm:$0xff] %v923_v56 }
 0x112   : > { %937 = vst [vmem:[%s1363_s25 + $0x68] sm:$0xff] %v905_v57  ;;  %953 = vst [vmem:[%s1363_s25 + $0xe8] sm:$0xff] %v921_v58 }
 0x113 PF: > { %s14_s17 = sadd.s32 1, %s1248_s17   ;;  %s1467_s15 = smov %s1244_s16 }
 0x114   : > { %p11_p5 = scmp.ge.s32.totalorder %s14_s17, 4   ;;  %s1468_s16 = smov %s1470_s18 }
 0x116   :  { %13 = sbr.rel (!%p11_p5) target bundleno = 2 (0x2), region = 80 }

// kernel: pallas_hourglass.18
= control target key start
LH: loop header
LB: loop body
LE: loop exit
PB: predicated region body
PF: predicated region fallthrough
CT: control target
= control target key end

     0   :  { %s602_s1 = inlined_call_operand.vmem [shape: bf16[128,128], index: 1, kind: input, shape index: {}]   ;;  %s603_s0 = inlined_call_operand.vmem [shape: bf16[128,128], index: 0, kind: input, shape index: {}]   ;;  %s604_s2 = inlined_call_operand.vmem [shape: f32[1,128], index: 2, kind: input, shape index: {}]   ;;  %s605_s3 = inlined_call_operand.vmem [shape: f32[128,128], index: 3, kind: output, shape index: {}]  }
   0x1   :  { %v467_v0 = vld [vmem:[%s602_s1 + $0x38] sm:$0xff]   ;;  %v468_v1 = vld [vmem:[%s602_s1 + $0x30] sm:$0xff]   ;;  %v469_v2 = vld [vmem:[%s602_s1 + $0x28] sm:$0xff]  }
   0x2   :  { %419 = vmatprep.subr.bf16.mxu0 %v467_v0  ;;  %451 = vmatprep.subr.bf16.mxu1 %v467_v0  ;;  %v470_v3 = vld [vmem:[%s602_s1 + $0x20] sm:$0xff]   ;;  %v471_v6 = vld [vmem:[%s602_s1 + $0x18] sm:$0xff]   ;;  %v472_v7 = vld [vmem:[%s602_s1 + $0x10] sm:$0xff]  }
   0x3   :  { %420 = vmatpush3.bf16.msra.mxu0 %v467_v0  ;;  %459 = vmatpush3.bf16.msra.mxu1 %v467_v0  ;;  %v475_v4 = vld [vmem:[%s603_s0] sm:$0xff]   ;;  %v473_v8 = vld [vmem:[%s602_s1 + $0x8] sm:$0xff]   ;;  %v479_v12 = vld [vmem:[%s603_s0 + $0x10] sm:$0xff]  }
   0x4   :  { %421 = vmatprep.subr.bf16.mxu0 %v468_v1  ;;  %452 = vmatprep.subr.bf16.mxu1 %v468_v1  ;;  %v476_v5 = vld [vmem:[%s603_s0 + $0x20] sm:$0xff]   ;;  %v477_v10 = vld [vmem:[%s603_s0 + $0x8] sm:$0xff]   ;;  %v480_v13 = vld [vmem:[%s603_s0 + $0x30] sm:$0xff]  }
   0x5   :  { %435 = vmatprep.mubr.bf16.mxu0 %v475_v4  ;;  %443 = vmatprep.mubr.bf16.mxu1 %v476_v5  ;;  %v474_v9 = vld [vmem:[%s602_s1] sm:$0xff]   ;;  %v478_v11 = vld [vmem:[%s603_s0 + $0x28] sm:$0xff]   ;;  %v481_v14 = vld [vmem:[%s603_s0 + $0x18] sm:$0xff]  }
   0x6   :  { %v482_v15 = vld [vmem:[%s603_s0 + $0x38] sm:$0xff]   ;;  %v402_v16 = vld [vmem:[%s604_s2] ss:$0 sm:$0xff] }
   0x7   :  { %422 = vmatpush3.bf16.msra.mxu0 %v468_v1  ;;  %460 = vmatpush3.bf16.msra.mxu1 %v468_v1 }
   0x8   :  { %423 = vmatprep.subr.bf16.mxu0 %v469_v2  ;;  %453 = vmatprep.subr.bf16.mxu1 %v469_v2 }
   0xb   :  { %424 = vmatpush3.bf16.msra.mxu0 %v469_v2  ;;  %461 = vmatpush3.bf16.msra.mxu1 %v469_v2 }
   0xc   :  { %425 = vmatprep.subr.bf16.mxu0 %v470_v3  ;;  %454 = vmatprep.subr.bf16.mxu1 %v470_v3 }
   0xf   :  { %426 = vmatpush3.bf16.msra.mxu0 %v470_v3  ;;  %462 = vmatpush3.bf16.msra.mxu1 %v470_v3 }
  0x10   :  { %427 = vmatprep.subr.bf16.mxu0 %v471_v6  ;;  %455 = vmatprep.subr.bf16.mxu1 %v471_v6 }
  0x13   :  { %428 = vmatpush3.bf16.msra.mxu0 %v471_v6  ;;  %463 = vmatpush3.bf16.msra.mxu1 %v471_v6 }
  0x14   :  { %429 = vmatprep.subr.bf16.mxu0 %v472_v7  ;;  %456 = vmatprep.subr.bf16.mxu1 %v472_v7 }
  0x17   :  { %430 = vmatpush3.bf16.msra.mxu0 %v472_v7  ;;  %464 = vmatpush3.bf16.msra.mxu1 %v472_v7 }
  0x18   :  { %431 = vmatprep.subr.bf16.mxu0 %v473_v8  ;;  %457 = vmatprep.subr.bf16.mxu1 %v473_v8 }
  0x1b   :  { %432 = vmatpush3.bf16.msra.mxu0 %v473_v8  ;;  %465 = vmatpush3.bf16.msra.mxu1 %v473_v8 }
  0x1c   :  { %433 = vmatprep.subr.bf16.mxu0 %v474_v9  ;;  %458 = vmatprep.subr.bf16.mxu1 %v474_v9 }
  0x1f   :  { %434 = vmatpush3.bf16.msra.mxu0 %v474_v9  ;;  %466 = vmatpush3.bf16.msra.mxu1 %v474_v9 }
  0x22   :  { %436 = vmatmul.mubr.bf16.vlgmr.msra.gmra.mxu0 %v477_v10  ;;  %444 = vmatmul.mubr.bf16.vlgmr.msra.gmra.mxu1 %v478_v11 }
  0x23   :  { %439 = vmatprep.mubr.bf16.mxu0 %v479_v12  ;;  %447 = vmatprep.mubr.bf16.mxu1 %v480_v13 }
  0x2a   :  { %440 = vmatmul.mubr.bf16.gmra.mxu0 %v481_v14  ;;  %448 = vmatmul.mubr.bf16.gmra.mxu1 %v482_v15 }
  0xe2   :  { %v437_v17 = vpop.f32.mrf.mxu0  ;;  %v445_v18 = vpop.f32.mrf.mxu1 }
  0xe3   :  { %v336_v19 = vadd.f32 %v437_v17, %v402_v16  ;;  %v344_v20 = vadd.f32 %v445_v18, %v402_v16 }
  0xe4   :  { %v213_v21 = vpop.f32.mrf.mxu0  ;;  %v245_v22 = vpop.f32.mrf.mxu1 }
  0xe5   :  { %v352_v23 = vmax.f32 %v336_v19, 0.0  ;;  %v360_v24 = vmax.f32 %v344_v20, 0.0  ;;  %v334_v25 = vadd.f32 %v402_v16, %v213_v21  ;;  %v342_v26 = vadd.f32 %v402_v16, %v245_v22 }
  0xe6   :  { %v438_v27 = vpop.f32.mrf.mxu0  ;;  %v446_v28 = vpop.f32.mrf.mxu1 }
  0xe7   :  { %368 = vst [vmem:[%s605_s3 + $0x10] sm:$0xff] %v352_v23  ;;  %376 = vst [vmem:[%s605_s3 + $0x50] sm:$0xff] %v360_v24  ;;  %v350_v29 = vmax.f32 %v334_v25, 0.0  ;;  %v358_v30 = vmax.f32 %v342_v26, 0.0  ;;  %v337_v31 = vadd.f32 %v438_v27, %v402_v16  ;;  %v345_v32 = vadd.f32 %v446_v28, %v402_v16 }
  0xe8   :  { %v216_v33 = vpop.f32.mrf.mxu0  ;;  %v248_v34 = vpop.f32.mrf.mxu1 }
  0xe9   :  { %366 = vst [vmem:[%s605_s3] sm:$0xff] %v350_v29  ;;  %374 = vst [vmem:[%s605_s3 + $0x40] sm:$0xff] %v358_v30  ;;  %v353_v35 = vmax.f32 %v337_v31, 0.0  ;;  %v361_v36 = vmax.f32 %v345_v32, 0.0  ;;  %v335_v37 = vadd.f32 %v402_v16, %v216_v33  ;;  %v343_v38 = vadd.f32 %v402_v16, %v248_v34 }
  0xea   :  { %v441_v39 = vpop.f32.mrf.mxu0  ;;  %v449_v40 = vpop.f32.mrf.mxu1 }
  0xeb   :  { %369 = vst [vmem:[%s605_s3 + $0x18] sm:$0xff] %v353_v35  ;;  %377 = vst [vmem:[%s605_s3 + $0x58] sm:$0xff] %v361_v36  ;;  %v351_v41 = vmax.f32 %v335_v37, 0.0  ;;  %v359_v42 = vmax.f32 %v343_v38, 0.0  ;;  %v340_v43 = vadd.f32 %v441_v39, %v402_v16  ;;  %v348_v44 = vadd.f32 %v449_v40, %v402_v16 }
  0xec   :  { %v229_v45 = vpop.f32.mrf.mxu0  ;;  %v261_v46 = vpop.f32.mrf.mxu1 }
  0xed   :  { %367 = vst [vmem:[%s605_s3 + $0x8] sm:$0xff] %v351_v41  ;;  %375 = vst [vmem:[%s605_s3 + $0x48] sm:$0xff] %v359_v42  ;;  %v356_v47 = vmax.f32 %v340_v43, 0.0  ;;  %v364_v48 = vmax.f32 %v348_v44, 0.0  ;;  %v338_v49 = vadd.f32 %v402_v16, %v229_v45  ;;  %v346_v50 = vadd.f32 %v402_v16, %v261_v46 }
  0xee   :  { %v442_v51 = vpop.f32.mrf.mxu0  ;;  %v450_v52 = vpop.f32.mrf.mxu1 }
  0xef   :  { %372 = vst [vmem:[%s605_s3 + $0x30] sm:$0xff] %v356_v47  ;;  %380 = vst [vmem:[%s605_s3 + $0x70] sm:$0xff] %v364_v48  ;;  %v354_v53 = vmax.f32 %v338_v49, 0.0  ;;  %v362_v54 = vmax.f32 %v346_v50, 0.0  ;;  %v341_v55 = vadd.f32 %v442_v51, %v402_v16  ;;  %v349_v56 = vadd.f32 %v450_v52, %v402_v16 }
  0xf0   :  { %v232_v57 = vpop.f32.mrf.mxu0  ;;  %v264_v58 = vpop.f32.mrf.mxu1 }
  0xf1   :  { %370 = vst [vmem:[%s605_s3 + $0x20] sm:$0xff] %v354_v53  ;;  %378 = vst [vmem:[%s605_s3 + $0x60] sm:$0xff] %v362_v54  ;;  %v357_v59 = vmax.f32 %v341_v55, 0.0  ;;  %v365_v60 = vmax.f32 %v349_v56, 0.0  ;;  %v339_v61 = vadd.f32 %v402_v16, %v232_v57  ;;  %v347_v62 = vadd.f32 %v402_v16, %v264_v58 }
  0xf3   :  { %373 = vst [vmem:[%s605_s3 + $0x38] sm:$0xff] %v357_v59  ;;  %381 = vst [vmem:[%s605_s3 + $0x78] sm:$0xff] %v365_v60  ;;  %v355_v63 = vmax.f32 %v339_v61, 0.0  ;;  %v363_v0 = vmax.f32 %v347_v62, 0.0 }
  0xf5   :  { %371 = vst [vmem:[%s605_s3 + $0x28] sm:$0xff] %v355_v63  ;;  %379 = vst [vmem:[%s605_s3 + $0x68] sm:$0xff] %v363_v0 }

// kernel: pallas_hourglass.19
= control target key start
LH: loop header
LB: loop body
LE: loop exit
PB: predicated region body
PF: predicated region fallthrough
CT: control target
= control target key end

     0   :  { %s586_s1 = inlined_call_operand.vmem [shape: bf16[128,128], index: 1, kind: input, shape index: {}]   ;;  %s587_s0 = inlined_call_operand.vmem [shape: bf16[128,128], index: 0, kind: input, shape index: {}]   ;;  %s588_s2 = inlined_call_operand.vmem [shape: f32[1,128], index: 2, kind: input, shape index: {}]   ;;  %s589_s3 = inlined_call_operand.vmem [shape: f32[128,128], index: 3, kind: output, shape index: {}]  }
   0x1   :  { %v451_v0 = vld [vmem:[%s586_s1 + $0x38] sm:$0xff]   ;;  %v452_v1 = vld [vmem:[%s586_s1 + $0x30] sm:$0xff]   ;;  %v453_v2 = vld [vmem:[%s586_s1 + $0x28] sm:$0xff]  }
   0x2   :  { %403 = vmatprep.subr.bf16.mxu0 %v451_v0  ;;  %435 = vmatprep.subr.bf16.mxu1 %v451_v0  ;;  %v454_v3 = vld [vmem:[%s586_s1 + $0x20] sm:$0xff]   ;;  %v455_v6 = vld [vmem:[%s586_s1 + $0x18] sm:$0xff]   ;;  %v456_v7 = vld [vmem:[%s586_s1 + $0x10] sm:$0xff]  }
   0x3   :  { %404 = vmatpush3.bf16.msra.mxu0 %v451_v0  ;;  %443 = vmatpush3.bf16.msra.mxu1 %v451_v0  ;;  %v459_v4 = vld [vmem:[%s587_s0] sm:$0xff]   ;;  %v457_v8 = vld [vmem:[%s586_s1 + $0x8] sm:$0xff]   ;;  %v463_v12 = vld [vmem:[%s587_s0 + $0x10] sm:$0xff]  }
   0x4   :  { %405 = vmatprep.subr.bf16.mxu0 %v452_v1  ;;  %436 = vmatprep.subr.bf16.mxu1 %v452_v1  ;;  %v460_v5 = vld [vmem:[%s587_s0 + $0x20] sm:$0xff]   ;;  %v461_v10 = vld [vmem:[%s587_s0 + $0x8] sm:$0xff]   ;;  %v464_v13 = vld [vmem:[%s587_s0 + $0x30] sm:$0xff]  }
   0x5   :  { %419 = vmatprep.mubr.bf16.mxu0 %v459_v4  ;;  %427 = vmatprep.mubr.bf16.mxu1 %v460_v5  ;;  %v458_v9 = vld [vmem:[%s586_s1] sm:$0xff]   ;;  %v462_v11 = vld [vmem:[%s587_s0 + $0x28] sm:$0xff]   ;;  %v465_v14 = vld [vmem:[%s587_s0 + $0x18] sm:$0xff]  }
   0x6   :  { %v466_v15 = vld [vmem:[%s587_s0 + $0x38] sm:$0xff]   ;;  %v386_v16 = vld [vmem:[%s588_s2] ss:$0 sm:$0xff] }
   0x7   :  { %406 = vmatpush3.bf16.msra.mxu0 %v452_v1  ;;  %444 = vmatpush3.bf16.msra.mxu1 %v452_v1 }
   0x8   :  { %407 = vmatprep.subr.bf16.mxu0 %v453_v2  ;;  %437 = vmatprep.subr.bf16.mxu1 %v453_v2 }
   0xb   :  { %408 = vmatpush3.bf16.msra.mxu0 %v453_v2  ;;  %445 = vmatpush3.bf16.msra.mxu1 %v453_v2 }
   0xc   :  { %409 = vmatprep.subr.bf16.mxu0 %v454_v3  ;;  %438 = vmatprep.subr.bf16.mxu1 %v454_v3 }
   0xf   :  { %410 = vmatpush3.bf16.msra.mxu0 %v454_v3  ;;  %446 = vmatpush3.bf16.msra.mxu1 %v454_v3 }
  0x10   :  { %411 = vmatprep.subr.bf16.mxu0 %v455_v6  ;;  %439 = vmatprep.subr.bf16.mxu1 %v455_v6 }
  0x13   :  { %412 = vmatpush3.bf16.msra.mxu0 %v455_v6  ;;  %447 = vmatpush3.bf16.msra.mxu1 %v455_v6 }
  0x14   :  { %413 = vmatprep.subr.bf16.mxu0 %v456_v7  ;;  %440 = vmatprep.subr.bf16.mxu1 %v456_v7 }
  0x17   :  { %414 = vmatpush3.bf16.msra.mxu0 %v456_v7  ;;  %448 = vmatpush3.bf16.msra.mxu1 %v456_v7 }
  0x18   :  { %415 = vmatprep.subr.bf16.mxu0 %v457_v8  ;;  %441 = vmatprep.subr.bf16.mxu1 %v457_v8 }
  0x1b   :  { %416 = vmatpush3.bf16.msra.mxu0 %v457_v8  ;;  %449 = vmatpush3.bf16.msra.mxu1 %v457_v8 }
  0x1c   :  { %417 = vmatprep.subr.bf16.mxu0 %v458_v9  ;;  %442 = vmatprep.subr.bf16.mxu1 %v458_v9 }
  0x1f   :  { %418 = vmatpush3.bf16.msra.mxu0 %v458_v9  ;;  %450 = vmatpush3.bf16.msra.mxu1 %v458_v9 }
  0x22   :  { %420 = vmatmul.mubr.bf16.vlgmr.msra.gmra.mxu0 %v461_v10  ;;  %428 = vmatmul.mubr.bf16.vlgmr.msra.gmra.mxu1 %v462_v11 }
  0x23   :  { %423 = vmatprep.mubr.bf16.mxu0 %v463_v12  ;;  %431 = vmatprep.mubr.bf16.mxu1 %v464_v13 }
  0x2a   :  { %424 = vmatmul.mubr.bf16.gmra.mxu0 %v465_v14  ;;  %432 = vmatmul.mubr.bf16.gmra.mxu1 %v466_v15 }
  0xe2   :  { %v421_v17 = vpop.f32.mrf.mxu0  ;;  %v429_v18 = vpop.f32.mrf.mxu1 }
  0xe3   :  { %v336_v19 = vadd.f32 %v421_v17, %v386_v16  ;;  %v344_v20 = vadd.f32 %v429_v18, %v386_v16 }
  0xe4   :  { %v213_v21 = vpop.f32.mrf.mxu0  ;;  %v245_v22 = vpop.f32.mrf.mxu1 }
  0xe5   :  { %352 = vst [vmem:[%s589_s3 + $0x10] sm:$0xff] %v336_v19  ;;  %360 = vst [vmem:[%s589_s3 + $0x50] sm:$0xff] %v344_v20  ;;  %v334_v23 = vadd.f32 %v386_v16, %v213_v21  ;;  %v342_v24 = vadd.f32 %v386_v16, %v245_v22 }
  0xe6   :  { %v422_v25 = vpop.f32.mrf.mxu0  ;;  %v430_v26 = vpop.f32.mrf.mxu1 }
  0xe7   :  { %350 = vst [vmem:[%s589_s3] sm:$0xff] %v334_v23  ;;  %358 = vst [vmem:[%s589_s3 + $0x40] sm:$0xff] %v342_v24  ;;  %v337_v27 = vadd.f32 %v422_v25, %v386_v16  ;;  %v345_v28 = vadd.f32 %v430_v26, %v386_v16 }
  0xe8   :  { %v216_v29 = vpop.f32.mrf.mxu0  ;;  %v248_v30 = vpop.f32.mrf.mxu1 }
  0xe9   :  { %353 = vst [vmem:[%s589_s3 + $0x18] sm:$0xff] %v337_v27  ;;  %361 = vst [vmem:[%s589_s3 + $0x58] sm:$0xff] %v345_v28  ;;  %v335_v31 = vadd.f32 %v386_v16, %v216_v29  ;;  %v343_v32 = vadd.f32 %v386_v16, %v248_v30 }
  0xea   :  { %v425_v33 = vpop.f32.mrf.mxu0  ;;  %v433_v34 = vpop.f32.mrf.mxu1 }
  0xeb   :  { %351 = vst [vmem:[%s589_s3 + $0x8] sm:$0xff] %v335_v31  ;;  %359 = vst [vmem:[%s589_s3 + $0x48] sm:$0xff] %v343_v32  ;;  %v340_v35 = vadd.f32 %v425_v33, %v386_v16  ;;  %v348_v36 = vadd.f32 %v433_v34, %v386_v16 }
  0xec   :  { %v229_v37 = vpop.f32.mrf.mxu0  ;;  %v261_v38 = vpop.f32.mrf.mxu1 }
  0xed   :  { %356 = vst [vmem:[%s589_s3 + $0x30] sm:$0xff] %v340_v35  ;;  %364 = vst [vmem:[%s589_s3 + $0x70] sm:$0xff] %v348_v36  ;;  %v338_v39 = vadd.f32 %v386_v16, %v229_v37  ;;  %v346_v40 = vadd.f32 %v386_v16, %v261_v38 }
  0xee   :  { %v426_v41 = vpop.f32.mrf.mxu0  ;;  %v434_v42 = vpop.f32.mrf.mxu1 }
  0xef   :  { %354 = vst [vmem:[%s589_s3 + $0x20] sm:$0xff] %v338_v39  ;;  %362 = vst [vmem:[%s589_s3 + $0x60] sm:$0xff] %v346_v40  ;;  %v341_v43 = vadd.f32 %v426_v41, %v386_v16  ;;  %v349_v44 = vadd.f32 %v434_v42, %v386_v16 }
  0xf0   :  { %v232_v45 = vpop.f32.mrf.mxu0  ;;  %v264_v46 = vpop.f32.mrf.mxu1 }
  0xf1   :  { %357 = vst [vmem:[%s589_s3 + $0x38] sm:$0xff] %v341_v43  ;;  %365 = vst [vmem:[%s589_s3 + $0x78] sm:$0xff] %v349_v44  ;;  %v339_v47 = vadd.f32 %v386_v16, %v232_v45  ;;  %v347_v48 = vadd.f32 %v386_v16, %v264_v46 }
  0xf3   :  { %355 = vst [vmem:[%s589_s3 + $0x28] sm:$0xff] %v339_v47  ;;  %363 = vst [vmem:[%s589_s3 + $0x68] sm:$0xff] %v347_v48 }

// kernel: pallas_hourglass.20
= control target key start
LH: loop header
LB: loop body
LE: loop exit
PB: predicated region body
PF: predicated region fallthrough
CT: control target
= control target key end

     0   :  { %s708_s1 = inlined_call_operand.vmem [shape: bf16[128,128], index: 1, kind: input, shape index: {}]   ;;  %s709_s0 = inlined_call_operand.vmem [shape: bf16[128,128], index: 0, kind: input, shape index: {}]   ;;  %s710_s2 = inlined_call_operand.vmem [shape: f32[1,128], index: 2, kind: input, shape index: {}]   ;;  %s711_s3 = inlined_call_operand.vmem [shape: f32[128,128], index: 3, kind: input, shape index: {}]   ;;  %s712_s4 = inlined_call_operand.vmem [shape: f32[128,128], index: 4, kind: output, shape index: {}]  }
   0x1   :  { %v502_v0 = vld [vmem:[%s708_s1 + $0x38] sm:$0xff]   ;;  %v503_v1 = vld [vmem:[%s708_s1 + $0x30] sm:$0xff]   ;;  %v504_v2 = vld [vmem:[%s708_s1 + $0x28] sm:$0xff]  }
   0x2   :  { %454 = vmatprep.subr.bf16.mxu0 %v502_v0  ;;  %486 = vmatprep.subr.bf16.mxu1 %v502_v0  ;;  %v505_v3 = vld [vmem:[%s708_s1 + $0x20] sm:$0xff]   ;;  %v506_v6 = vld [vmem:[%s708_s1 + $0x18] sm:$0xff]   ;;  %v507_v7 = vld [vmem:[%s708_s1 + $0x10] sm:$0xff]  }
   0x3   :  { %455 = vmatpush3.bf16.msra.mxu0 %v502_v0  ;;  %494 = vmatpush3.bf16.msra.mxu1 %v502_v0  ;;  %v510_v4 = vld [vmem:[%s709_s0] sm:$0xff]   ;;  %v508_v8 = vld [vmem:[%s708_s1 + $0x8] sm:$0xff]   ;;  %v514_v12 = vld [vmem:[%s709_s0 + $0x10] sm:$0xff]  }
   0x4   :  { %456 = vmatprep.subr.bf16.mxu0 %v503_v1  ;;  %487 = vmatprep.subr.bf16.mxu1 %v503_v1  ;;  %v511_v5 = vld [vmem:[%s709_s0 + $0x20] sm:$0xff]   ;;  %v512_v10 = vld [vmem:[%s709_s0 + $0x8] sm:$0xff]   ;;  %v515_v13 = vld [vmem:[%s709_s0 + $0x30] sm:$0xff]  }
   0x5   :  { %470 = vmatprep.mubr.bf16.mxu0 %v510_v4  ;;  %478 = vmatprep.mubr.bf16.mxu1 %v511_v5  ;;  %v509_v9 = vld [vmem:[%s708_s1] sm:$0xff]   ;;  %v513_v11 = vld [vmem:[%s709_s0 + $0x28] sm:$0xff]   ;;  %v516_v14 = vld [vmem:[%s709_s0 + $0x18] sm:$0xff]  }
   0x6   :  { %v517_v15 = vld [vmem:[%s709_s0 + $0x38] sm:$0xff]   ;;  %v594_v16 = vld [vmem:[%s710_s2] ss:$0 sm:$0xff]  ;;  %v355_v18 = vld [vmem:[%s711_s3 + $0x10] sm:$0xff] }
   0x7   :  { %457 = vmatpush3.bf16.msra.mxu0 %v503_v1  ;;  %495 = vmatpush3.bf16.msra.mxu1 %v503_v1  ;;  %v363_v20 = vld [vmem:[%s711_s3 + $0x50] sm:$0xff]  ;;  %v353_v24 = vld [vmem:[%s711_s3] sm:$0xff]  ;;  %v356_v37 = vld [vmem:[%s711_s3 + $0x18] sm:$0xff] }
   0x8   :  { %458 = vmatprep.subr.bf16.mxu0 %v504_v2  ;;  %488 = vmatprep.subr.bf16.mxu1 %v504_v2  ;;  %v361_v26 = vld [vmem:[%s711_s3 + $0x40] sm:$0xff]  ;;  %v364_v38 = vld [vmem:[%s711_s3 + $0x58] sm:$0xff]  ;;  %v354_v42 = vld [vmem:[%s711_s3 + $0x8] sm:$0xff] }
   0x9   :  { %v362_v44 = vld [vmem:[%s711_s3 + $0x48] sm:$0xff]  ;;  %v359_v52 = vld [vmem:[%s711_s3 + $0x30] sm:$0xff]  ;;  %v365_v4 = vld [vmem:[%s711_s3 + $0x60] sm:$0xff] }
   0xa   :  { %v367_v54 = vld [vmem:[%s711_s3 + $0x70] sm:$0xff] }
   0xb   :  { %459 = vmatpush3.bf16.msra.mxu0 %v504_v2  ;;  %496 = vmatpush3.bf16.msra.mxu1 %v504_v2 }
   0xc   :  { %460 = vmatprep.subr.bf16.mxu0 %v505_v3  ;;  %489 = vmatprep.subr.bf16.mxu1 %v505_v3 }
   0xf   :  { %461 = vmatpush3.bf16.msra.mxu0 %v505_v3  ;;  %497 = vmatpush3.bf16.msra.mxu1 %v505_v3  ;;  %v357_v3 = vld [vmem:[%s711_s3 + $0x20] sm:$0xff] }
  0x10   :  { %462 = vmatprep.subr.bf16.mxu0 %v506_v6  ;;  %490 = vmatprep.subr.bf16.mxu1 %v506_v6 }
  0x13   :  { %463 = vmatpush3.bf16.msra.mxu0 %v506_v6  ;;  %498 = vmatpush3.bf16.msra.mxu1 %v506_v6 }
  0x14   :  { %464 = vmatprep.subr.bf16.mxu0 %v507_v7  ;;  %491 = vmatprep.subr.bf16.mxu1 %v507_v7 }
  0x17   :  { %465 = vmatpush3.bf16.msra.mxu0 %v507_v7  ;;  %499 = vmatpush3.bf16.msra.mxu1 %v507_v7 }
  0x18   :  { %466 = vmatprep.subr.bf16.mxu0 %v508_v8  ;;  %492 = vmatprep.subr.bf16.mxu1 %v508_v8 }
  0x1b   :  { %467 = vmatpush3.bf16.msra.mxu0 %v508_v8  ;;  %500 = vmatpush3.bf16.msra.mxu1 %v508_v8  ;;  %v360_v8 = vld [vmem:[%s711_s3 + $0x38] sm:$0xff] }
  0x1c   :  { %468 = vmatprep.subr.bf16.mxu0 %v509_v9  ;;  %493 = vmatprep.subr.bf16.mxu1 %v509_v9 }
  0x1f   :  { %469 = vmatpush3.bf16.msra.mxu0 %v509_v9  ;;  %501 = vmatpush3.bf16.msra.mxu1 %v509_v9 }
  0x22   :  { %471 = vmatmul.mubr.bf16.vlgmr.msra.gmra.mxu0 %v512_v10  ;;  %479 = vmatmul.mubr.bf16.vlgmr.msra.gmra.mxu1 %v513_v11  ;;  %v368_v10 = vld [vmem:[%s711_s3 + $0x78] sm:$0xff] }
  0x23   :  { %474 = vmatprep.mubr.bf16.mxu0 %v514_v12  ;;  %482 = vmatprep.mubr.bf16.mxu1 %v515_v13 }
  0x2a   :  { %475 = vmatmul.mubr.bf16.gmra.mxu0 %v516_v14  ;;  %483 = vmatmul.mubr.bf16.gmra.mxu1 %v517_v15 }
  0xe2   :  { %v472_v17 = vpop.f32.mrf.mxu0  ;;  %v480_v19 = vpop.f32.mrf.mxu1 }
  0xe3   :  { %v339_v21 = vadd.f32 %v472_v17, %v594_v16  ;;  %v347_v22 = vadd.f32 %v480_v19, %v594_v16  ;;  %v358_v19 = vld [vmem:[%s711_s3 + $0x28] sm:$0xff] }
  0xe4   :  { %v216_v23 = vpop.f32.mrf.mxu0  ;;  %v248_v25 = vpop.f32.mrf.mxu1 }
  0xe5   :  { %v371_v27 = vadd.f32 %v355_v18, %v339_v21  ;;  %v379_v28 = vadd.f32 %v363_v20, %v347_v22  ;;  %v337_v29 = vadd.f32 %v594_v16, %v216_v23  ;;  %v345_v30 = vadd.f32 %v594_v16, %v248_v25  ;;  %v366_v21 = vld [vmem:[%s711_s3 + $0x68] sm:$0xff] }
  0xe6   :  { %v473_v31 = vpop.f32.mrf.mxu0  ;;  %v481_v32 = vpop.f32.mrf.mxu1 }
  0xe7   :  { %v387_v33 = vmax.f32 %v371_v27, 0.0  ;;  %v395_v34 = vmax.f32 %v379_v28, 0.0  ;;  %v369_v35 = vadd.f32 %v353_v24, %v337_v29  ;;  %v377_v36 = vadd.f32 %v361_v26, %v345_v30 }
  0xe8   :  { %v340_v39 = vadd.f32 %v473_v31, %v594_v16  ;;  %v348_v40 = vadd.f32 %v481_v32, %v594_v16  ;;  %v219_v41 = vpop.f32.mrf.mxu0  ;;  %v251_v43 = vpop.f32.mrf.mxu1 }
  0xe9   :  { %403 = vst [vmem:[%s712_s4 + $0x10] sm:$0xff] %v387_v33  ;;  %411 = vst [vmem:[%s712_s4 + $0x50] sm:$0xff] %v395_v34  ;;  %v385_v45 = vmax.f32 %v369_v35, 0.0  ;;  %v393_v46 = vmax.f32 %v377_v36, 0.0  ;;  %v338_v47 = vadd.f32 %v594_v16, %v219_v41  ;;  %v346_v48 = vadd.f32 %v594_v16, %v251_v43 }
  0xea   :  { %v372_v49 = vadd.f32 %v356_v37, %v340_v39  ;;  %v380_v50 = vadd.f32 %v364_v38, %v348_v40  ;;  %v476_v51 = vpop.f32.mrf.mxu0  ;;  %v484_v53 = vpop.f32.mrf.mxu1 }
  0xeb   :  { %401 = vst [vmem:[%s712_s4] sm:$0xff] %v385_v45  ;;  %409 = vst [vmem:[%s712_s4 + $0x40] sm:$0xff] %v393_v46  ;;  %v370_v55 = vadd.f32 %v354_v42, %v338_v47  ;;  %v378_v56 = vadd.f32 %v362_v44, %v346_v48  ;;  %v343_v57 = vadd.f32 %v476_v51, %v594_v16 }
  0xec   :  { %v351_v58 = vadd.f32 %v484_v53, %v594_v16  ;;  %v388_v59 = vmax.f32 %v372_v49, 0.0  ;;  %v396_v60 = vmax.f32 %v380_v50, 0.0  ;;  %v232_v61 = vpop.f32.mrf.mxu0  ;;  %v264_v62 = vpop.f32.mrf.mxu1 }
  0xed   :  { %v386_v63 = vmax.f32 %v370_v55, 0.0  ;;  %v394_v0 = vmax.f32 %v378_v56, 0.0  ;;  %v375_v1 = vadd.f32 %v359_v52, %v343_v57  ;;  %v341_v5 = vadd.f32 %v594_v16, %v232_v61 }
  0xee   :  { %v383_v2 = vadd.f32 %v367_v54, %v351_v58  ;;  %404 = vst [vmem:[%s712_s4 + $0x18] sm:$0xff] %v388_v59  ;;  %412 = vst [vmem:[%s712_s4 + $0x58] sm:$0xff] %v396_v60  ;;  %v349_v6 = vadd.f32 %v594_v16, %v264_v62  ;;  %v477_v7 = vpop.f32.mrf.mxu0  ;;  %v485_v9 = vpop.f32.mrf.mxu1 }
  0xef   :  { %402 = vst [vmem:[%s712_s4 + $0x8] sm:$0xff] %v386_v63  ;;  %410 = vst [vmem:[%s712_s4 + $0x48] sm:$0xff] %v394_v0  ;;  %v391_v11 = vmax.f32 %v375_v1, 0.0  ;;  %v344_v13 = vadd.f32 %v477_v7, %v594_v16  ;;  %v352_v14 = vadd.f32 %v485_v9, %v594_v16  ;;  %v373_v15 = vadd.f32 %v357_v3, %v341_v5 }
  0xf0   :  { %v399_v12 = vmax.f32 %v383_v2, 0.0  ;;  %v381_v17 = vadd.f32 %v365_v4, %v349_v6  ;;  %v235_v18 = vpop.f32.mrf.mxu0  ;;  %v267_v20 = vpop.f32.mrf.mxu1 }
  0xf1   :  { %407 = vst [vmem:[%s712_s4 + $0x30] sm:$0xff] %v391_v11  ;;  %v376_v22 = vadd.f32 %v360_v8, %v344_v13  ;;  %v384_v23 = vadd.f32 %v368_v10, %v352_v14  ;;  %v342_v24 = vadd.f32 %v594_v16, %v235_v18  ;;  %v350_v25 = vadd.f32 %v594_v16, %v267_v20 }
  0xf2   :  { %415 = vst [vmem:[%s712_s4 + $0x70] sm:$0xff] %v399_v12  ;;  %v389_v26 = vmax.f32 %v373_v15, 0.0  ;;  %v397_v27 = vmax.f32 %v381_v17, 0.0 }
  0xf3   :  { %v392_v28 = vmax.f32 %v376_v22, 0.0  ;;  %v400_v29 = vmax.f32 %v384_v23, 0.0  ;;  %v374_v30 = vadd.f32 %v358_v19, %v342_v24  ;;  %v382_v31 = vadd.f32 %v366_v21, %v350_v25 }
  0xf4   :  { %405 = vst [vmem:[%s712_s4 + $0x20] sm:$0xff] %v389_v26  ;;  %413 = vst [vmem:[%s712_s4 + $0x60] sm:$0xff] %v397_v27 }
  0xf5   :  { %408 = vst [vmem:[%s712_s4 + $0x38] sm:$0xff] %v392_v28  ;;  %416 = vst [vmem:[%s712_s4 + $0x78] sm:$0xff] %v400_v29  ;;  %v390_v16 = vmax.f32 %v374_v30, 0.0  ;;  %v398_v32 = vmax.f32 %v382_v31, 0.0 }
  0xf7   :  { %406 = vst [vmem:[%s712_s4 + $0x28] sm:$0xff] %v390_v16  ;;  %414 = vst [vmem:[%s712_s4 + $0x68] sm:$0xff] %v398_v32 }

// kernel: pallas_hourglass.23
= control target key start
LH: loop header
LB: loop body
LE: loop exit
PB: predicated region body
PF: predicated region fallthrough
CT: control target
= control target key end

     0   :  { %s310_s1 = inlined_call_operand.vmem [shape: bf16[128,128], index: 1, kind: input, shape index: {}]   ;;  %s311_s0 = inlined_call_operand.vmem [shape: bf16[32,128], index: 0, kind: input, shape index: {}]   ;;  %s312_s2 = inlined_call_operand.vmem [shape: f32[1,128], index: 2, kind: input, shape index: {}]   ;;  %s313_s3 = inlined_call_operand.vmem [shape: f32[32,128], index: 3, kind: output, shape index: {}]  }
   0x1   :  { %v235_v0 = vld [vmem:[%s310_s1 + $0x38] sm:$0xff]   ;;  %v236_v1 = vld [vmem:[%s310_s1 + $0x30] sm:$0xff]   ;;  %v237_v2 = vld [vmem:[%s310_s1 + $0x28] sm:$0xff]  }
   0x2   :  { %215 = vmatprep.subr.bf16.mxu0 %v235_v0  ;;  %v238_v3 = vld [vmem:[%s310_s1 + $0x20] sm:$0xff]   ;;  %v239_v5 = vld [vmem:[%s310_s1 + $0x18] sm:$0xff]   ;;  %v240_v6 = vld [vmem:[%s310_s1 + $0x10] sm:$0xff]  }
   0x3   :  { %216 = vmatpush3.bf16.msra.mxu0 %v235_v0  ;;  %v243_v4 = vld [vmem:[%s311_s0] sm:$0xff]   ;;  %v241_v7 = vld [vmem:[%s310_s1 + $0x8] sm:$0xff]  }
   0x4   :  { %217 = vmatprep.subr.bf16.mxu0 %v236_v1  ;;  %231 = vmatprep.mubr.bf16.mxu0 %v243_v4  ;;  %v242_v8 = vld [vmem:[%s310_s1] sm:$0xff]   ;;  %v244_v9 = vld [vmem:[%s311_s0 + $0x8] sm:$0xff]  }
   0x5   :  { %v204_v10 = vld [vmem:[%s312_s2] ss:$0 sm:$0xff] }
   0x7   :  { %218 = vmatpush3.bf16.msra.mxu0 %v236_v1 }
   0x8   :  { %219 = vmatprep.subr.bf16.mxu0 %v237_v2 }
   0xb   :  { %220 = vmatpush3.bf16.msra.mxu0 %v237_v2 }
   0xc   :  { %221 = vmatprep.subr.bf16.mxu0 %v238_v3 }
   0xf   :  { %222 = vmatpush3.bf16.msra.mxu0 %v238_v3 }
  0x10   :  { %223 = vmatprep.subr.bf16.mxu0 %v239_v5 }
  0x13   :  { %224 = vmatpush3.bf16.msra.mxu0 %v239_v5 }
  0x14   :  { %225 = vmatprep.subr.bf16.mxu0 %v240_v6 }
  0x17   :  { %226 = vmatpush3.bf16.msra.mxu0 %v240_v6 }
  0x18   :  { %227 = vmatprep.subr.bf16.mxu0 %v241_v7 }
  0x1b   :  { %228 = vmatpush3.bf16.msra.mxu0 %v241_v7 }
  0x1c   :  { %229 = vmatprep.subr.bf16.mxu0 %v242_v8 }
  0x1f   :  { %230 = vmatpush3.bf16.msra.mxu0 %v242_v8 }
  0x22   :  { %232 = vmatmul.mubr.bf16.vlgmr.msra.gmra.mxu0 %v244_v9 }
  0xe2   :  { %v233_v11 = vpop.f32.mrf.mxu0 }
  0xe3   :  { %v180_v12 = vadd.f32 %v233_v11, %v204_v10 }
  0xe4   :  { %v141_v13 = vpop.f32.mrf.mxu0 }
  0xe5   :  { %v184_v14 = vmax.f32 %v180_v12, 0.0  ;;  %v178_v15 = vadd.f32 %v204_v10, %v141_v13 }
  0xe6   :  { %v234_v16 = vpop.f32.mrf.mxu0 }
  0xe7   :  { %188 = vst [vmem:[%s313_s3 + $0x10] sm:$0xff] %v184_v14  ;;  %v182_v17 = vmax.f32 %v178_v15, 0.0  ;;  %v181_v18 = vadd.f32 %v234_v16, %v204_v10 }
  0xe8   :  { %v144_v19 = vpop.f32.mrf.mxu0 }
  0xe9   :  { %186 = vst [vmem:[%s313_s3] sm:$0xff] %v182_v17  ;;  %v185_v20 = vmax.f32 %v181_v18, 0.0  ;;  %v179_v21 = vadd.f32 %v204_v10, %v144_v19 }
  0xeb   :  { %189 = vst [vmem:[%s313_s3 + $0x18] sm:$0xff] %v185_v20  ;;  %v183_v22 = vmax.f32 %v179_v21, 0.0 }
  0xed   :  { %187 = vst [vmem:[%s313_s3 + $0x8] sm:$0xff] %v183_v22 }

// kernel: pallas_hourglass.24
= control target key start
LH: loop header
LB: loop body
LE: loop exit
PB: predicated region body
PF: predicated region fallthrough
CT: control target
= control target key end

     0   :  { %s338_s1 = inlined_call_operand.vmem [shape: bf16[128,128], index: 1, kind: input, shape index: {}]   ;;  %s339_s0 = inlined_call_operand.vmem [shape: bf16[32,128], index: 0, kind: input, shape index: {}]   ;;  %s340_s2 = inlined_call_operand.vmem [shape: f32[1,128], index: 2, kind: input, shape index: {}]   ;;  %s341_s3 = inlined_call_operand.vmem [shape: f32[32,128], index: 3, kind: input, shape index: {}]   ;;  %s342_s4 = inlined_call_operand.vmem [shape: f32[32,128], index: 4, kind: output, shape index: {}]  }
   0x1   :  { %v246_v0 = vld [vmem:[%s338_s1 + $0x38] sm:$0xff]   ;;  %v247_v1 = vld [vmem:[%s338_s1 + $0x30] sm:$0xff]   ;;  %v248_v2 = vld [vmem:[%s338_s1 + $0x28] sm:$0xff]  }
   0x2   :  { %226 = vmatprep.subr.bf16.mxu0 %v246_v0  ;;  %v249_v3 = vld [vmem:[%s338_s1 + $0x20] sm:$0xff]   ;;  %v250_v5 = vld [vmem:[%s338_s1 + $0x18] sm:$0xff]   ;;  %v251_v6 = vld [vmem:[%s338_s1 + $0x10] sm:$0xff]  }
   0x3   :  { %227 = vmatpush3.bf16.msra.mxu0 %v246_v0  ;;  %v254_v4 = vld [vmem:[%s339_s0] sm:$0xff]   ;;  %v252_v7 = vld [vmem:[%s338_s1 + $0x8] sm:$0xff]   ;;  %v187_v12 = vld [vmem:[%s341_s3 + $0x10] sm:$0xff] }
   0x4   :  { %228 = vmatprep.subr.bf16.mxu0 %v247_v1  ;;  %242 = vmatprep.mubr.bf16.mxu0 %v254_v4  ;;  %v253_v8 = vld [vmem:[%s338_s1] sm:$0xff]   ;;  %v255_v9 = vld [vmem:[%s339_s0 + $0x8] sm:$0xff]   ;;  %v188_v19 = vld [vmem:[%s341_s3 + $0x18] sm:$0xff] }
   0x5   :  { %v215_v10 = vld [vmem:[%s340_s2] ss:$0 sm:$0xff]  ;;  %v186_v24 = vld [vmem:[%s341_s3 + $0x8] sm:$0xff] }
   0x6   :  { %v185_v15 = vld [vmem:[%s341_s3] sm:$0xff] }
   0x7   :  { %229 = vmatpush3.bf16.msra.mxu0 %v247_v1 }
   0x8   :  { %230 = vmatprep.subr.bf16.mxu0 %v248_v2 }
   0xb   :  { %231 = vmatpush3.bf16.msra.mxu0 %v248_v2 }
   0xc   :  { %232 = vmatprep.subr.bf16.mxu0 %v249_v3 }
   0xf   :  { %233 = vmatpush3.bf16.msra.mxu0 %v249_v3 }
  0x10   :  { %234 = vmatprep.subr.bf16.mxu0 %v250_v5 }
  0x13   :  { %235 = vmatpush3.bf16.msra.mxu0 %v250_v5 }
  0x14   :  { %236 = vmatprep.subr.bf16.mxu0 %v251_v6 }
  0x17   :  { %237 = vmatpush3.bf16.msra.mxu0 %v251_v6 }
  0x18   :  { %238 = vmatprep.subr.bf16.mxu0 %v252_v7 }
  0x1b   :  { %239 = vmatpush3.bf16.msra.mxu0 %v252_v7 }
  0x1c   :  { %240 = vmatprep.subr.bf16.mxu0 %v253_v8 }
  0x1f   :  { %241 = vmatpush3.bf16.msra.mxu0 %v253_v8 }
  0x22   :  { %243 = vmatmul.mubr.bf16.vlgmr.msra.gmra.mxu0 %v255_v9 }
  0xe2   :  { %v244_v11 = vpop.f32.mrf.mxu0 }
  0xe3   :  { %v183_v13 = vadd.f32 %v244_v11, %v215_v10 }
  0xe4   :  { %v144_v14 = vpop.f32.mrf.mxu0 }
  0xe5   :  { %v191_v16 = vadd.f32 %v187_v12, %v183_v13  ;;  %v181_v17 = vadd.f32 %v215_v10, %v144_v14 }
  0xe6   :  { %v245_v18 = vpop.f32.mrf.mxu0 }
  0xe7   :  { %v195_v20 = vmax.f32 %v191_v16, 0.0  ;;  %v189_v21 = vadd.f32 %v185_v15, %v181_v17  ;;  %v184_v22 = vadd.f32 %v245_v18, %v215_v10 }
  0xe8   :  { %v147_v23 = vpop.f32.mrf.mxu0 }
  0xe9   :  { %199 = vst [vmem:[%s342_s4 + $0x10] sm:$0xff] %v195_v20  ;;  %v193_v25 = vmax.f32 %v189_v21, 0.0  ;;  %v192_v26 = vadd.f32 %v188_v19, %v184_v22  ;;  %v182_v27 = vadd.f32 %v215_v10, %v147_v23 }
  0xeb   :  { %197 = vst [vmem:[%s342_s4] sm:$0xff] %v193_v25  ;;  %v196_v28 = vmax.f32 %v192_v26, 0.0  ;;  %v190_v29 = vadd.f32 %v186_v24, %v182_v27 }
  0xed   :  { %200 = vst [vmem:[%s342_s4 + $0x18] sm:$0xff] %v196_v28  ;;  %v194_v30 = vmax.f32 %v190_v29, 0.0 }
  0xef   :  { %198 = vst [vmem:[%s342_s4 + $0x8] sm:$0xff] %v194_v30 }

</bundles_post_ra>
